<compile_context>
chip_gen: v7x
topology: tpu7x:2x2x1
jax: 0.10.0
libtpu: 0.0.40
codegen_flags: <defaults>
</compile_context>

<pallas_src>
import jax
import jax.numpy as jnp
from jax.experimental import pallas as pl
from jax.experimental.pallas import tpu as pltpu

INPUT_SIZE = 64 * 64 * 3   # 12288
HIDDEN = 128
NUM_CLASSES = 3
OUT_PAD = 128              # lane-dense output width; real logits are [:, :3]
TK = 3072                  # reduction tile: 12288 / 3072 = 4 pipelined K steps
TM_MAX = 512               # batch tile (x tile = 6 MiB; fits all generations)


def _round_up(x, m):
    return (x + m - 1) // m * m


def _mlp_kernel(x_ref, w1_ref, b1_ref, w2_ref, b2_ref, o_ref, acc_ref):
    # grid = (batch_tiles, k_tiles); K (reduction) is the innermost axis.
    k = pl.program_id(1)

    @pl.when(k == 0)
    def _():
        acc_ref[...] = jnp.zeros_like(acc_ref)

    # W1 is fully resident in VMEM; slice the current K chunk in-kernel.
    k0 = pl.multiple_of(k * TK, 128)
    acc_ref[...] += jnp.dot(x_ref[...], w1_ref[pl.ds(k0, TK), :],
                            preferred_element_type=jnp.float32)

    @pl.when(k == pl.num_programs(1) - 1)
    def _():
        h = jnp.maximum(acc_ref[...] + b1_ref[...], 0.0)          # bias + ReLU
        y = jnp.dot(h, w2_ref[...], preferred_element_type=jnp.float32)
        o_ref[...] = (y + b2_ref[...]).astype(o_ref.dtype)


@jax.jit
def simple_nn_forward(x_nchw, w1, b1, w2, b2):
    """x_nchw: (B, 3, 64, 64) float32. Returns (B, NUM_CLASSES) float32."""
    B = x_nchw.shape[0]
    x_flat = x_nchw.reshape(B, -1)                 # nn.Flatten (row-major C*H*W)

    # Tiny-batch guard only: pad up to 8 rows so the single tile is exact.
    rows = B
    if rows < 8:
        x_flat = jnp.pad(x_flat, ((0, 8 - rows), (0, 0)))
        rows = 8

    # Batch tiling: no whole-array pad — Pallas handles the partial edge block.
    tm = min(TM_MAX, _round_up(rows, 8))
    grid_m = pl.cdiv(rows, tm)
    grid = (grid_m, INPUT_SIZE // TK)

    # Lane-dense output: zero-pad the 3-wide head to 128 columns.
    w2_p = jnp.pad(w2, ((0, 0), (0, OUT_PAD - NUM_CLASSES)))
    b2_p = jnp.pad(b2, (0, OUT_PAD - NUM_CLASSES)).reshape(1, OUT_PAD)
    b1_2d = b1.reshape(1, HIDDEN)

    out = pl.pallas_call(
        _mlp_kernel,
        out_shape=jax.ShapeDtypeStruct((grid_m * tm, OUT_PAD), jnp.float32),
        grid_spec=pltpu.PrefetchScalarGridSpec(
            num_scalar_prefetch=0,
            grid=grid,
            in_specs=[
                pl.BlockSpec((tm, TK), lambda i, k: (i, k)),              # x tile (streamed)
                pl.BlockSpec((INPUT_SIZE, HIDDEN), lambda i, k: (0, 0)),  # W1 (VMEM-resident)
                pl.BlockSpec((1, HIDDEN), lambda i, k: (0, 0)),           # b1 (resident)
                pl.BlockSpec((HIDDEN, OUT_PAD), lambda i, k: (0, 0)),     # W2 padded (resident)
                pl.BlockSpec((1, OUT_PAD), lambda i, k: (0, 0)),          # b2 padded (resident)
            ],
            out_specs=pl.BlockSpec((tm, OUT_PAD), lambda i, k: (i, 0)),
            scratch_shapes=[pltpu.VMEM((tm, HIDDEN), jnp.float32)],
        ),
        compiler_params=pltpu.CompilerParams(
            dimension_semantics=("parallel", "arbitrary"),
            vmem_limit_bytes=64 << 20),
    )(x_flat, w1, b1_2d, w2_p, b2_p)

    return out[:B, :NUM_CLASSES]


def init_params(key):
    """Deterministic init mimicking PyTorch Linear default (uniform +/- 1/sqrt(fan_in))."""
    k1, k2, k3, k4 = jax.random.split(key, 4)
    lim1 = 1.0 / jnp.sqrt(jnp.float32(INPUT_SIZE))
    lim2 = 1.0 / jnp.sqrt(jnp.float32(HIDDEN))
    w1 = jax.random.uniform(k1, (INPUT_SIZE, HIDDEN), jnp.float32, -lim1, lim1)
    b1 = jax.random.uniform(k2, (HIDDEN,), jnp.float32, -lim1, lim1)
    w2 = jax.random.uniform(k3, (HIDDEN, NUM_CLASSES), jnp.float32, -lim2, lim2)
    b2 = jax.random.uniform(k4, (NUM_CLASSES,), jnp.float32, -lim2, lim2)
    return w1, b1, w2, b2


if __name__ == "__main__":
    key = jax.random.PRNGKey(0)
    kx, kp = jax.random.split(key)
    x = jax.random.normal(kx, (2, 3, 64, 64), jnp.float32)   # small batch, NCHW
    w1, b1, w2, b2 = init_params(kp)

    out = simple_nn_forward(x, w1, b1, w2, b2)
    out = jax.block_until_ready(out)

    # Pure-JAX reference of the same math.
    ref = jnp.maximum(x.reshape(2, -1) @ w1 + b1, 0.0) @ w2 + b2
    assert out.shape == (2, NUM_CLASSES)
    assert jnp.allclose(out, ref, atol=2e-4, rtol=2e-4)

    print("KERNEL_OK")
</pallas_src>

<mosaic_0001>
module attributes {stable_mosaic.version = 11 : i64} {
  func.func @_mlp_kernel(%arg0: i32, %arg1: i32, %arg2: memref<8x3072xf32, #tpu.memory_space<vmem>>, %arg3: memref<12288x128xf32, #tpu.memory_space<vmem>>, %arg4: memref<1x128xf32, #tpu.memory_space<vmem>>, %arg5: memref<128x128xf32, #tpu.memory_space<vmem>>, %arg6: memref<1x128xf32, #tpu.memory_space<vmem>>, %arg7: memref<8x128xf32, #tpu.memory_space<vmem>>, %arg8: memref<8x128xf32, #tpu.memory_space<vmem>>) attributes {dimension_semantics = [#tpu.dimension_semantics<parallel>, #tpu.dimension_semantics<arbitrary>], iteration_bounds = array<i64: 1, 4>, scalar_prefetch = 0 : i64, scratch_operands = 1 : i64, tpu.core_type = #tpu.core_type<tc>, window_params = [{transform_indices = @transform_0, window_bounds = array<i64: 8, 3072>}, {pipeline_mode = #tpu.pipeline_mode<synchronous>, transform_indices = @transform_1, window_bounds = array<i64: 12288, 128>}, {pipeline_mode = #tpu.pipeline_mode<synchronous>, transform_indices = @transform_2, window_bounds = array<i64: 1, 128>}, {pipeline_mode = #tpu.pipeline_mode<synchronous>, transform_indices = @transform_3, window_bounds = array<i64: 128, 128>}, {pipeline_mode = #tpu.pipeline_mode<synchronous>, transform_indices = @transform_4, window_bounds = array<i64: 1, 128>}, {transform_indices = @transform_5, window_bounds = array<i64: 8, 128>}]} {
    %c0_i32 = arith.constant 0 : i32
    %0 = arith.cmpi eq, %arg1, %c0_i32 : i32
    %1 = arith.extui %0 : i1 to i32
    %c0_i32_0 = arith.constant 0 : i32
    %2 = arith.cmpi ne, %1, %c0_i32_0 : i32
    scf.if %2 {
      %cst_8 = arith.constant 0.000000e+00 : f32
      %15 = vector.broadcast %cst_8 : f32 to vector<8x128xf32>
      %c0_9 = arith.constant 0 : index
      %c0_10 = arith.constant 0 : index
      %16 = vector.load %arg8[%c0_9, %c0_10] : memref<8x128xf32, #tpu.memory_space<vmem>>, vector<8x128xf32>
      tpu.vector_store %arg8[%c0_9, %c0_10], %15 {strides = array<i32>} : memref<8x128xf32, #tpu.memory_space<vmem>>, vector<8x128xf32>,
    } else {
    }
    %c3072_i32 = arith.constant 3072 : i32
    %3 = arith.muli %arg1, %c3072_i32 : i32
    %4 = tpu.assume_multiple %3, 128 : i32
    %c0 = arith.constant 0 : index
    %c0_1 = arith.constant 0 : index
    %5 = vector.load %arg8[%c0, %c0_1] : memref<8x128xf32, #tpu.memory_space<vmem>>, vector<8x128xf32>
    %c0_2 = arith.constant 0 : index
    %c0_3 = arith.constant 0 : index
    %6 = vector.load %arg2[%c0_2, %c0_3] : memref<8x3072xf32, #tpu.memory_space<vmem>>, vector<8x3072xf32>
    %7 = arith.index_cast %4 : i32 to index
    %c0_4 = arith.constant 0 : index
    %8 = vector.load %arg3[%7, %c0_4] : memref<12288x128xf32, #tpu.memory_space<vmem>>, vector<3072x128xf32>
    %cst = arith.constant dense<0.000000e+00> : vector<8x128xf32>
    %9 = tpu.matmul %6, %8, %cst {dimension_numbers = #tpu.dot_dimension_numbers<[1], [0], [0], [1], [0, 0, 1, 1], [], []>} : vector<8x3072xf32>, vector<3072x128xf32>, vector<8x128xf32> -> vector<8x128xf32>
    %10 = arith.addf %5, %9 : vector<8x128xf32>
    %c0_5 = arith.constant 0 : index
    %c0_6 = arith.constant 0 : index
    %11 = vector.load %arg8[%c0_5, %c0_6] : memref<8x128xf32, #tpu.memory_space<vmem>>, vector<8x128xf32>
    tpu.vector_store %arg8[%c0_5, %c0_6], %10 {strides = array<i32>} : memref<8x128xf32, #tpu.memory_space<vmem>>, vector<8x128xf32>,
    %c3_i32 = arith.constant 3 : i32
    %12 = arith.cmpi eq, %arg1, %c3_i32 : i32
    %13 = arith.extui %12 : i1 to i32
    %c0_i32_7 = arith.constant 0 : i32
    %14 = arith.cmpi ne, %13, %c0_i32_7 : i32
    scf.if %14 {
      %c0_8 = arith.constant 0 : index
      %c0_9 = arith.constant 0 : index
      %15 = vector.load %arg8[%c0_8, %c0_9] : memref<8x128xf32, #tpu.memory_space<vmem>>, vector<8x128xf32>
      %c0_10 = arith.constant 0 : index
      %c0_11 = arith.constant 0 : index
      %16 = vector.load %arg4[%c0_10, %c0_11] : memref<1x128xf32, #tpu.memory_space<vmem>>, vector<1x128xf32>
      %17 = vector.broadcast %16 : vector<1x128xf32> to vector<8x128xf32>
      %18 = arith.addf %15, %17 : vector<8x128xf32>
      %cst_12 = arith.constant 0.000000e+00 : f32
      %19 = vector.broadcast %cst_12 : f32 to vector<8x128xf32>
      %20 = arith.maximumf %18, %19 : vector<8x128xf32>
      %c0_13 = arith.constant 0 : index
      %c0_14 = arith.constant 0 : index
      %21 = vector.load %arg5[%c0_13, %c0_14] : memref<128x128xf32, #tpu.memory_space<vmem>>, vector<128x128xf32>
      %cst_15 = arith.constant dense<0.000000e+00> : vector<8x128xf32>
      %22 = tpu.matmul %20, %21, %cst_15 {dimension_numbers = #tpu.dot_dimension_numbers<[1], [0], [0], [1], [0, 0, 1, 1], [], []>} : vector<8x128xf32>, vector<128x128xf32>, vector<8x128xf32> -> vector<8x128xf32>
      %c0_16 = arith.constant 0 : index
      %c0_17 = arith.constant 0 : index
      %23 = vector.load %arg6[%c0_16, %c0_17] : memref<1x128xf32, #tpu.memory_space<vmem>>, vector<1x128xf32>
      %24 = vector.broadcast %23 : vector<1x128xf32> to vector<8x128xf32>
      %25 = arith.addf %22, %24 : vector<8x128xf32>
      %c0_18 = arith.constant 0 : index
      %c0_19 = arith.constant 0 : index
      %26 = vector.load %arg7[%c0_18, %c0_19] : memref<8x128xf32, #tpu.memory_space<vmem>>, vector<8x128xf32>
      tpu.vector_store %arg7[%c0_18, %c0_19], %25 {strides = array<i32>} : memref<8x128xf32, #tpu.memory_space<vmem>>, vector<8x128xf32>,
    } else {
    }
    return
  }
  func.func @transform_0(%arg0: i32, %arg1: i32) -> (i32, i32) {
    %c0_i32 = arith.constant 0 : i32
    return %arg0, %arg1 : i32, i32
  }
  func.func @transform_1(%arg0: i32, %arg1: i32) -> (i32, i32) {
    %c0_i32 = arith.constant 0 : i32
    %c0_i32_0 = arith.constant 0 : i32
    %c0_i32_1 = arith.constant 0 : i32
    return %c0_i32, %c0_i32_0 : i32, i32
  }
  func.func @transform_2(%arg0: i32, %arg1: i32) -> (i32, i32) {
    %c0_i32 = arith.constant 0 : i32
    %c0_i32_0 = arith.constant 0 : i32
    %c0_i32_1 = arith.constant 0 : i32
    return %c0_i32, %c0_i32_0 : i32, i32
  }
  func.func @transform_3(%arg0: i32, %arg1: i32) -> (i32, i32) {
    %c0_i32 = arith.constant 0 : i32
    %c0_i32_0 = arith.constant 0 : i32
    %c0_i32_1 = arith.constant 0 : i32
    return %c0_i32, %c0_i32_0 : i32, i32
  }
  func.func @transform_4(%arg0: i32, %arg1: i32) -> (i32, i32) {
    %c0_i32 = arith.constant 0 : i32
    %c0_i32_0 = arith.constant 0 : i32
    %c0_i32_1 = arith.constant 0 : i32
    return %c0_i32, %c0_i32_0 : i32, i32
  }
  func.func @transform_5(%arg0: i32, %arg1: i32) -> (i32, i32) {
    %c0_i32 = arith.constant 0 : i32
    %c0_i32_0 = arith.constant 0 : i32
    return %arg0, %c0_i32 : i32, i32
  }
}

</mosaic_0001>

<bundles_post_ra>
// kernel: simple_nn_forward.1
= control target key start
LH: loop header
LB: loop body
LE: loop exit
PB: predicated region body
PF: predicated region fallthrough
CT: control target
= control target key end

     0   :  { %10 = vsyncpa [#allocation4], 0  ;;  %s3752_s0 = inlined_call_operand.hbm [shape: f32[8,12288], index: 0, kind: input, shape index: {}]   ;;  %s3753_s1 = inlined_call_operand.hbm [shape: f32[12288,128], index: 1, kind: input, shape index: {}]   ;;  %s3754_s2 = inlined_call_operand.hbm [shape: f32[1,128], index: 2, kind: input, shape index: {}]   ;;  %s3755_s3 = inlined_call_operand.hbm [shape: f32[128,128], index: 3, kind: input, shape index: {}]   ;;  %s3756_s4 = inlined_call_operand.hbm [shape: f32[1,128], index: 4, kind: input, shape index: {}]   ;;  %s3757_s5 = inlined_call_operand.hbm [shape: f32[8,128], index: 5, kind: output, shape index: {}]  }
   0x1   :  { %12 = vsyncpa [#allocation4 + $0x1], 0 }
   0x2   :  { %13 = vsyncpa [#allocation7], 0 }
   0x3   :  { %14 = vsyncpa [#allocation10], 0 }
   0x4   :  { %15 = vsyncpa [#allocation5], 0  ;;  %s3071_s18 = smov 0   ;;  %s3073_s19 = smov 0  }
   0x5   :  { %s3075_s20 = smov 0   ;;  %s3077_s21 = smov 0  }
   0x6   :  { %s3079_s22 = smov 0   ;;  %s3081_s23 = smov 0  }
   0x7 LB: > { %s1784_s24 = sadd.s32 4294967295, %s3027_s23   ;;  %p1785_p0 = scmp.ge.s32.totalorder %s3027_s23, 1  ;;  %s3027_s23 = sphi %s3081_s23, %s21_s23   ;;  %s3023_s22 = sphi %s3079_s22, %s3775_s22   ;;  %s3019_s21 = sphi %s3077_s21, %s3774_s21   ;;  %s3015_s20 = sphi %s3075_s20, %s3773_s20   ;;  %s3011_s19 = sphi %s3073_s19, %s3772_s19   ;;  %s3007_s18 = sphi %s3071_s18, %s3771_s18  }
   0x8   : > { %p3105_p1 = scmp.eq.s32.totalorder %s1784_s24, 0  ;;  %p176_p2 = scmp.lt.s32.totalorder %s3027_s23, 5 }
   0x9   : > { %s3029_s27 = smov [#allocation6]   ;;  %s3030_s30 = smov [#allocation9]  }
   0xa   : > { %s3761_s25 = scalar_select %p3105_p1, 1, 0 }
   0xb   : > { %p3110_p3 = pnand %p1785_p0, %p176_p2  ;;  %s188_s28 = sshll.u32 %s3029_s27, 4  ;;  %s3114_s28 = int_to_ptr.vmem [resolvable:$true] %s188_s28 }
   0xc   : > { %s212_s6 = sshll.u32 %s3030_s30, 4  ;;  %s3031_s7 = smov [#allocation8]   ;;  %s3124_s6 = int_to_ptr.vmem [resolvable:$true] %s212_s6 }
   0xd   : > { %s3762_s26 = scalar_select %p3110_p3, 1, 0 }
   0xe   : > { %p2710_p4 = pneg %p3110_p3  ;;  %s3126_s8 = sshll.u32 %s3031_s7, 4  ;;  %s203_s8 = int_to_ptr.vmem [resolvable:$true] %s3126_s8 }
   0xf   : > { %s2797_s11 = scalar_lea.hbm %s3753_s1, 196608 }
  0x10   : > { %p3120_p5 = pnand %p2710_p4, %p3105_p1  ;;  %p2798_p6 = scmp.ne.s32.totalorder %s3753_s1, %s2797_s11 }
  0x11   : > { %p2804_p10 = scmp.lt.u32.totalorder %s2797_s11, %s3753_s1 }
  0x12   : > { %p3136_p7 = pneg %p3120_p5 }
  0x14   : > { %p2800_p8 = pnand %p3136_p7, %p2798_p6 }
  0x16   : > { %p2801_p9 = pneg %p2800_p8 }
  0x18   : > { %p2806_p11 = pnand %p2804_p10, %p2801_p9 }
  0x1a   : > { %2809 = shalt.err (!%p2806_p11)
}
  0x1b   : > { %s2810_s17 = scalar_lea.vmem %s3114_s28, 196608  ;;  %p2818_p2 = scmp.lt.s32.totalorder %s3114_s28, %s3114_s28 }
  0x1c   : > { %p2811_p12 = scmp.ne.s32.totalorder %s3114_s28, %s2810_s17  ;;  %p2819_p4 = scmp.lt.s32.totalorder %s2810_s17, %s2810_s17 }
  0x1e   : > { %p2813_p13 = pnand %p2811_p12, %p3136_p7  ;;  %p2820_p6 = por %p2819_p4, %p2818_p2 }
  0x20   : > { %p2814_p0 = pneg %p2813_p13 }
  0x22   : > { %p2821_p8 = pnand %p2820_p6, %p2814_p0 }
  0x24   : > { %2824 = shalt.err (!%p2821_p8)
}
  0x25   : > { %s3032_s27 = smov 128   ;;  %s3033_s30 = smov 8  }
  0x26   : > { %2713 = dma.hbm_to_vmem [thread:$0]  (!%p3120_p5), %s3753_s1, 196608, %s3114_s28, [#allocation7], %s3032_s27, %s3032_s27, %s3033_s30  }
  0x27   : > { %s2825_s12 = scalar_lea.hbm %s3755_s3, 2048 }
  0x28   : > { %p2826_p9 = scmp.ne.s32.totalorder %s3755_s3, %s2825_s12  ;;  %p2832_p12 = scmp.lt.u32.totalorder %s2825_s12, %s3755_s3 }
  0x2a   : > { %p2828_p10 = pnand %p2826_p9, %p3136_p7 }
  0x2c   : > { %p2829_p11 = pneg %p2828_p10 }
  0x2e   : > { %p2834_p13 = pnand %p2832_p12, %p2829_p11 }
  0x30   : > { %2837 = shalt.err (!%p2834_p13)
}
  0x31   : > { %s2838_s28 = scalar_lea.vmem %s3124_s6, 2048  ;;  %p2846_p6 = scmp.lt.s32.totalorder %s3124_s6, %s3124_s6 }
  0x32   : > { %p2839_p0 = scmp.ne.s32.totalorder %s3124_s6, %s2838_s28  ;;  %p2847_p8 = scmp.lt.s32.totalorder %s2838_s28, %s2838_s28 }
  0x34   : > { %p2841_p2 = pnand %p2839_p0, %p3136_p7  ;;  %p2848_p9 = por %p2847_p8, %p2846_p6 }
  0x36   : > { %p2842_p4 = pneg %p2841_p2 }
  0x38   : > { %p2849_p10 = pnand %p2848_p9, %p2842_p4 }
  0x3a   : > { %2852 = shalt.err (!%p2849_p10)
}
  0x3b   : > { %2719 = dma.hbm_to_vmem [thread:$0]  (!%p3120_p5), %s3755_s3, 2048, %s3124_s6, [#allocation10], %s3032_s27, %s3032_s27, %s3033_s30  }
  0x3c   : > { %s2853_s12 = scalar_lea.hbm %s3754_s2, 16 }
  0x3d   : > { %p2854_p11 = scmp.ne.s32.totalorder %s3754_s2, %s2853_s12  ;;  %p2860_p0 = scmp.lt.u32.totalorder %s2853_s12, %s3754_s2 }
  0x3f   : > { %p2856_p12 = pnand %p2854_p11, %p3136_p7 }
  0x41   : > { %p2857_p13 = pneg %p2856_p12 }
  0x43   : > { %p2862_p2 = pnand %p2860_p0, %p2857_p13 }
  0x45   : > { %2865 = shalt.err (!%p2862_p2)
}
  0x46   : > { %s2866_s28 = scalar_lea.vmem %s203_s8, 16  ;;  %s2873_s6 = scalar_lea.vmem %s203_s8, 32 }
  0x47   : > { %p2867_p4 = scmp.ne.s32.totalorder %s203_s8, %s2866_s28  ;;  %p2874_p9 = scmp.lt.s32.totalorder %s203_s8, %s203_s8 }
  0x48   : > { %p2875_p10 = scmp.lt.s32.totalorder %s2873_s6, %s2866_s28 }
  0x49   : > { %p2869_p6 = pnand %p2867_p4, %p3136_p7 }
  0x4a   : > { %p2876_p3 = por %p2875_p10, %p2874_p9 }
  0x4b   : > { %p2870_p8 = pneg %p2869_p6 }
  0x4d   : > { %p2877_p1 = pnand %p2876_p3, %p2870_p8 }
  0x4f   : > { %2880 = shalt.err (!%p2877_p1)
}
  0x50   : > { %2716 = dma.hbm_to_vmem [thread:$0]  (!%p3120_p5), %s3754_s2, 16, %s203_s8, [#allocation7]  }
  0x51   : > { %s3034_s7 = smov [#allocation11]   ;;  %s2881_s12 = scalar_lea.hbm %s3756_s4, 16 }
  0x52   : > { %s226_s9 = sshll.u32 %s3034_s7, 4  ;;  %p2882_p11 = scmp.ne.s32.totalorder %s3756_s4, %s2881_s12  ;;  %s227_s9 = int_to_ptr.vmem [resolvable:$true] %s226_s9 }
  0x53   : > { %p2888_p12 = scmp.lt.u32.totalorder %s2881_s12, %s3756_s4 }
  0x54   : > { %p2884_p1 = pnand %p2882_p11, %p3136_p7 }
  0x56   : > { %p2885_p3 = pneg %p2884_p1 }
  0x58   : > { %p2890_p13 = pnand %p2888_p12, %p2885_p3 }
  0x5a   : > { %2893 = shalt.err (!%p2890_p13)
}
  0x5b   : > { %s2894_s8 = scalar_lea.vmem %s227_s9, 16  ;;  %s2901_s28 = scalar_lea.vmem %s227_s9, 32 }
  0x5c   : > { %p2895_p0 = scmp.ne.s32.totalorder %s227_s9, %s2894_s8  ;;  %p2902_p6 = scmp.lt.s32.totalorder %s227_s9, %s227_s9 }
  0x5d   : > { %p2903_p8 = scmp.lt.s32.totalorder %s2901_s28, %s2894_s8 }
  0x5e   : > { %p2897_p2 = pnand %p2895_p0, %p3136_p7 }
  0x5f   : > { %p2904_p9 = por %p2903_p8, %p2902_p6 }
  0x60   : > { %p2898_p4 = pneg %p2897_p2 }
  0x62   : > { %p2905_p10 = pnand %p2904_p9, %p2898_p4 }
  0x64   : > { %2908 = shalt.err (!%p2905_p10)
}
  0x65   : > { %2722 = dma.hbm_to_vmem [thread:$0]  (!%p3120_p5), %s3756_s4, 16, %s227_s9, [#allocation10]  }
  0x66   : > { %s30_s14 = sadd.s32 1, %s3023_s22  ;;  %s42_s30 = sadd.s32 1, %s3015_s20 }
  0x67   : > { %p31_p7 = scmp.ge.s32.totalorder %s30_s14, 4  ;;  %p49_p11 = scmp.ne.s32.totalorder %s3015_s20, %s3011_s19 }
  0x68   : > { %p50_p1 = scmp.eq.s32.totalorder %s3027_s23, 0  ;;  %p55_p3 = scmp.ne.s32.totalorder %s3011_s19, %s3007_s18 }
  0x69   : > { %s3777_s14 = smov (%p31_p7, %s30_s14), 0  ;;  %p3765_p13 = scmp.ne.s32.totalorder %s3761_s25, 0 }
  0x6a   : > { %p51_p12 = por %p50_p1, %p49_p11  ;;  %s38_s7 = ssub.s32 %s3023_s22, %s3777_s14 }
  0x6b   : > { %p3228_p0 = por %p3765_p13, %p55_p3  ;;  %p2731_p2 = scmp.lt.s32.totalorder %s3027_s23, 4 }
  0x6c   : > { %p40_p4 = scmp.eq.s32.totalorder %s38_s7, 0  ;;  %s237_s9 = sand.u32 1, %s3015_s20  }
  0x6d   : > { %s2686_s10 = smul.u32 192, %s237_s9  ;;  %p3240_p5 = pnand %p2731_p2, %p51_p12 }
  0x6e   : > { %s3237_s11 = scalar_select %p40_p4, %s3015_s20, %s42_s30  }
  0x6f   : > { %s1805_s12 = smul.u32 3072, %s3023_s22  ;;  %s241_s13 = scalar_lea.vmem [#allocation3], %s2686_s10 }
  0x70   : > { %s251_s15 = sshll.u32 %s241_s13, 4  ;;  %s238_s28 = scalar_lea.sflag [#allocation4], %s237_s9  ;;  %s3249_s15 = int_to_ptr.vmem [resolvable:$true] %s251_s15 }
  0x71   : > { %s3247_s8 = scalar_lea.hbm %s3752_s0, %s1805_s12  ;;  %p2911_p8 = pneg %p3240_p5 }
  0x72   : > { %s2909_s6 = scalar_lea.hbm %s3247_s8, 3072  ;;  %s2914_s7 = scalar_lea.hbm %s3752_s0, 12288 }
  0x73   : > { %p2910_p6 = scmp.ne.s32.totalorder %s3247_s8, %s2909_s6  ;;  %p2915_p7 = scmp.lt.u32.totalorder %s3247_s8, %s3752_s0 }
  0x74   : > { %p2916_p11 = scmp.lt.u32.totalorder %s2914_s7, %s2909_s6  ;;  %p2918_p3 = scmp.lt.u32.totalorder %s2909_s6, %s3247_s8 }
  0x75   : > { %p2912_p9 = pnand %p2911_p8, %p2910_p6 }
  0x76   : > { %p2917_p1 = por %p2916_p11, %p2915_p7 }
  0x77   : > { %p2913_p10 = pneg %p2912_p9 }
  0x78   : > { %p2919_p12 = por %p2918_p3, %p2917_p1 }
  0x7a   : > { %p2920_p13 = pnand %p2919_p12, %p2913_p10 }
  0x7c   : > { %2923 = shalt.err (!%p2920_p13)
}
  0x7d   : > { %s2924_s9 = scalar_lea.vmem %s3249_s15, 3072  ;;  %s3035_s13 = smov [#allocation3]  }
  0x7e   : > { %p2925_p2 = scmp.ne.s32.totalorder %s3249_s15, %s2924_s9  ;;  %s2929_s16 = sshll.u32 %s3035_s13, 4  ;;  %s2930_s16 = int_to_ptr.vmem [resolvable:$false] %s2929_s16 }
  0x7f   : > { %s2931_s17 = scalar_lea.vmem %s2930_s16, 6144  ;;  %p2932_p9 = scmp.lt.s32.totalorder %s3249_s15, %s2930_s16 }
  0x80   : > { %p2927_p4 = pnand %p2925_p2, %p2911_p8  ;;  %p2933_p7 = scmp.lt.s32.totalorder %s2931_s17, %s2924_s9 }
  0x82   : > { %p2928_p6 = pneg %p2927_p4  ;;  %p2934_p11 = por %p2933_p7, %p2932_p9 }
  0x84   : > { %p2935_p1 = pnand %p2934_p11, %p2928_p6 }
  0x86   : > { %2938 = shalt.err (!%p2935_p1)
}
  0x87   : > { %2726 = dma.hbm_to_vmem [thread:$0]  (!%p3240_p5), %s3247_s8, 3072, %s3249_s15, %s238_s28  }
  0x88   : > { %p3768_p10 = scmp.ne.s32.totalorder %s3762_s26, 0 }
  0x89   : > { %s262_s6 = sand.u32 (!%p3768_p10), 1, %s3011_s19  }
  0x8a   : > { %260 = sbr.rel (%p3768_p10) target bundleno = 832 (0x340), region = 40  ;;  %s263_s30 = scalar_lea.sflag (!%p3768_p10), [#allocation4], %s262_s6 }
  0x8b   : > { %s2687_s27 = smul.u32 (!%p3768_p10), 192, %s262_s6 }
  0x8d   : > { %s3279_s7 = scalar_lea.vmem (!%p3768_p10), [#allocation3], %s2687_s27 }
  0x91   : > { %2990 = dma.done.wait (%p3228_p0), %s263_s30, 3072  }
  0x92   : > { %2992 = vsyncadd (%p3228_p0), %s263_s30, 4294964224  ;;  %p3769_p8 = scmp.ne.s32.totalorder %s3761_s25, 0 }
  0x94   : > { %2994 = dma.done.wait (%p3769_p8), [#allocation7], 196624  }
  0x95   : > { %2996 = vsyncadd (%p3769_p8), [#allocation7], 4294770672 }
  0x96   : > { %2998 = dma.done.wait (%p3769_p8), [#allocation10], 2064  }
  0x97   : > { %3000 = vsyncadd (%p3769_p8), [#allocation10], 4294965232  ;;  %p1797_p5 = scmp.ne.s32.totalorder %s3019_s21, 0 }
  0x98   : > { %v3036_v0 = vmov (!%p1797_p5), 0.0  }
  0x99   : > { %308 = sbr.rel (%p1797_p5) target bundleno = 160 (0xa0), region = 64  ;;  %309 = vst [vmem:[#allocation2] sm:$0xff] (!%p1797_p5), %v3036_v0 }
  0xa0 PF: > { %s310_s26 = smul.u32 3072, %s3019_s21  ;;  %v313_v1 = vld [vmem:[%s3279_s7 + $0x8] sm:$0xff]  ;;  %v315_v2 = vld [vmem:[%s3279_s7 + $0x18] sm:$0xff]  ;;  %p1798_p0 = scmp.ne.s32.totalorder %s3019_s21, 3 }
  0xa1   : > { %785 = vmatprep.mubr.f32.mxu0 %v313_v1  ;;  %855 = vmatprep.mubr.f32.mxu1 %v315_v2  ;;  %vm3038_vm0 = vmmov (!%p1798_p0), 0  }
  0xa2   : > { %s3297_s29 = scalar_lea.vmem [#allocation6], %s310_s26 }
  0xa3   : > { %v353_v3 = vld [vmem:[%s3297_s29 + $0x80] sm:$0xff]  ;;  %v354_v4 = vld [vmem:[%s3297_s29 + $0x88] sm:$0xff]  ;;  %v355_v14 = vld [vmem:[%s3297_s29 + $0x90] sm:$0xff] }
  0xa4   : > { %v385_v5 = vld [vmem:[%s3297_s29 + $0x180] sm:$0xff]  ;;  %v2278_v6 = vpack.c.bf16 %v354_v4, %v353_v3  ;;  %v386_v7 = vld [vmem:[%s3297_s29 + $0x188] sm:$0xff]  ;;  %v356_v16 = vld [vmem:[%s3297_s29 + $0x98] sm:$0xff] }
  0xa5   : > { %v337_v8 = vld [vmem:[%s3297_s29] sm:$0xff]  ;;  %v338_v9 = vld [vmem:[%s3297_s29 + $0x8] sm:$0xff]  ;;  %v2310_v10 = vpack.c.bf16 %v386_v7, %v385_v5  ;;  %v387_v17 = vld [vmem:[%s3297_s29 + $0x190] sm:$0xff]  ;;  %v2282_v19 = vpack.c.bf16 %v356_v16, %v355_v14 }
  0xa6   : > { %v2280_v11 = vpack.c.bf16 %v338_v9, %v337_v8  ;;  %v369_v12 = vld [vmem:[%s3297_s29 + $0x100] sm:$0xff]  ;;  %v370_v13 = vld [vmem:[%s3297_s29 + $0x108] sm:$0xff]  ;;  %2279 = vmatprep.subr.bf16.mxu0 %v2278_v6  ;;  %v388_v18 = vld [vmem:[%s3297_s29 + $0x198] sm:$0xff] }
  0xa7   : > { %v2312_v15 = vpack.c.bf16 %v370_v13, %v369_v12  ;;  %2311 = vmatprep.subr.bf16.mxu1 %v2310_v10  ;;  %v2314_v20 = vpack.c.bf16 %v388_v18, %v387_v17  ;;  %v339_v21 = vld [vmem:[%s3297_s29 + $0x10] sm:$0xff]  ;;  %v340_v22 = vld [vmem:[%s3297_s29 + $0x18] sm:$0xff]  ;;  %v357_v26 = vld [vmem:[%s3297_s29 + $0xa0] sm:$0xff] }
  0xa8   : > { %2281 = vmatpush3.bf16.msra.mxu0 %v2280_v11  ;;  %v371_v23 = vld [vmem:[%s3297_s29 + $0x110] sm:$0xff]  ;;  %v2284_v24 = vpack.c.bf16 %v340_v22, %v339_v21  ;;  %v372_v25 = vld [vmem:[%s3297_s29 + $0x118] sm:$0xff]  ;;  %v358_v27 = vld [vmem:[%s3297_s29 + $0xa8] sm:$0xff] }
  0xa9   : > { %2313 = vmatpush3.bf16.msra.mxu1 %v2312_v15  ;;  %2283 = vmatprep.subr.bf16.mxu0 %v2282_v19  ;;  %v2316_v28 = vpack.c.bf16 %v372_v25, %v371_v23  ;;  %v2286_v29 = vpack.c.bf16 %v358_v27, %v357_v26  ;;  %v389_v30 = vld [vmem:[%s3297_s29 + $0x1a0] sm:$0xff]  ;;  %v390_v31 = vld [vmem:[%s3297_s29 + $0x1a8] sm:$0xff]  ;;  %v359_v38 = vld [vmem:[%s3297_s29 + $0xb0] sm:$0xff] }
  0xaa   : > { %2315 = vmatprep.subr.bf16.mxu1 %v2314_v20  ;;  %v341_v32 = vld [vmem:[%s3297_s29 + $0x20] sm:$0xff]  ;;  %v2318_v33 = vpack.c.bf16 %v390_v31, %v389_v30  ;;  %v342_v34 = vld [vmem:[%s3297_s29 + $0x28] sm:$0xff]  ;;  %v360_v39 = vld [vmem:[%s3297_s29 + $0xb8] sm:$0xff] }
  0xab   : > { %v373_v35 = vld [vmem:[%s3297_s29 + $0x120] sm:$0xff]  ;;  %v374_v36 = vld [vmem:[%s3297_s29 + $0x128] sm:$0xff]  ;;  %v2288_v37 = vpack.c.bf16 %v342_v34, %v341_v32  ;;  %v391_v40 = vld [vmem:[%s3297_s29 + $0x1b0] sm:$0xff]  ;;  %v2290_v42 = vpack.c.bf16 %v360_v39, %v359_v38 }
  0xac   : > { %2285 = vmatpush3.bf16.msra.mxu0 %v2284_v24  ;;  %v2320_v41 = vpack.c.bf16 %v374_v36, %v373_v35  ;;  %v392_v43 = vld [vmem:[%s3297_s29 + $0x1b8] sm:$0xff]  ;;  %v343_v44 = vld [vmem:[%s3297_s29 + $0x30] sm:$0xff]  ;;  %v361_v49 = vld [vmem:[%s3297_s29 + $0xc0] sm:$0xff] }
  0xad   : > { %2317 = vmatpush3.bf16.msra.mxu1 %v2316_v28  ;;  %2287 = vmatprep.subr.bf16.mxu0 %v2286_v29  ;;  %v344_v45 = vld [vmem:[%s3297_s29 + $0x38] sm:$0xff]  ;;  %v2322_v46 = vpack.c.bf16 %v392_v43, %v391_v40  ;;  %v375_v47 = vld [vmem:[%s3297_s29 + $0x130] sm:$0xff]  ;;  %v362_v50 = vld [vmem:[%s3297_s29 + $0xc8] sm:$0xff] }
  0xae   : > { %2319 = vmatprep.subr.bf16.mxu1 %v2318_v33  ;;  %v376_v48 = vld [vmem:[%s3297_s29 + $0x138] sm:$0xff]  ;;  %v393_v51 = vld [vmem:[%s3297_s29 + $0x1c0] sm:$0xff]  ;;  %v394_v52 = vld [vmem:[%s3297_s29 + $0x1c8] sm:$0xff]  ;;  %v2292_v53 = vpack.c.bf16 %v344_v45, %v343_v44  ;;  %v2294_v55 = vpack.c.bf16 %v362_v50, %v361_v49 }
  0xaf   : > { %v2324_v54 = vpack.c.bf16 %v376_v48, %v375_v47  ;;  %v345_v56 = vld [vmem:[%s3297_s29 + $0x40] sm:$0xff]  ;;  %v346_v57 = vld [vmem:[%s3297_s29 + $0x48] sm:$0xff]  ;;  %v2326_v59 = vpack.c.bf16 %v394_v52, %v393_v51  ;;  %v363_v61 = vld [vmem:[%s3297_s29 + $0xd0] sm:$0xff] }
  0xb0   : > { %2289 = vmatpush3.bf16.msra.mxu0 %v2288_v37  ;;  %v377_v58 = vld [vmem:[%s3297_s29 + $0x140] sm:$0xff]  ;;  %v378_v60 = vld [vmem:[%s3297_s29 + $0x148] sm:$0xff]  ;;  %v364_v62 = vld [vmem:[%s3297_s29 + $0xd8] sm:$0xff]  ;;  %v2296_v1 = vpack.c.bf16 %v346_v57, %v345_v56 }
  0xb1   : > { %2321 = vmatpush3.bf16.msra.mxu1 %v2320_v41  ;;  %2291 = vmatprep.subr.bf16.mxu0 %v2290_v42  ;;  %v395_v63 = vld [vmem:[%s3297_s29 + $0x1d0] sm:$0xff]  ;;  %v396_v0 = vld [vmem:[%s3297_s29 + $0x1d8] sm:$0xff]  ;;  %v2328_v2 = vpack.c.bf16 %v378_v60, %v377_v58  ;;  %v2298_v3 = vpack.c.bf16 %v364_v62, %v363_v61  ;;  %v365_v9 = vld [vmem:[%s3297_s29 + $0xe0] sm:$0xff] }
  0xb2   : > { %2323 = vmatprep.subr.bf16.mxu1 %v2322_v46  ;;  %v347_v4 = vld [vmem:[%s3297_s29 + $0x50] sm:$0xff]  ;;  %v348_v5 = vld [vmem:[%s3297_s29 + $0x58] sm:$0xff]  ;;  %v2330_v7 = vpack.c.bf16 %v396_v0, %v395_v63  ;;  %v366_v10 = vld [vmem:[%s3297_s29 + $0xe8] sm:$0xff] }
  0xb3   : > { %v379_v6 = vld [vmem:[%s3297_s29 + $0x150] sm:$0xff]  ;;  %v380_v8 = vld [vmem:[%s3297_s29 + $0x158] sm:$0xff]  ;;  %v397_v11 = vld [vmem:[%s3297_s29 + $0x1e0] sm:$0xff]  ;;  %v2300_v13 = vpack.c.bf16 %v348_v5, %v347_v4  ;;  %v2302_v15 = vpack.c.bf16 %v366_v10, %v365_v9 }
  0xb4   : > { %2293 = vmatpush3.bf16.msra.mxu0 %v2292_v53  ;;  %v398_v12 = vld [vmem:[%s3297_s29 + $0x1e8] sm:$0xff]  ;;  %v2332_v14 = vpack.c.bf16 %v380_v8, %v379_v6  ;;  %v349_v16 = vld [vmem:[%s3297_s29 + $0x60] sm:$0xff]  ;;  %v367_v21 = vld [vmem:[%s3297_s29 + $0xf0] sm:$0xff] }
  0xb5   : > { %2325 = vmatpush3.bf16.msra.mxu1 %v2324_v54  ;;  %2295 = vmatprep.subr.bf16.mxu0 %v2294_v55  ;;  %v350_v17 = vld [vmem:[%s3297_s29 + $0x68] sm:$0xff]  ;;  %v381_v18 = vld [vmem:[%s3297_s29 + $0x160] sm:$0xff]  ;;  %v2334_v19 = vpack.c.bf16 %v398_v12, %v397_v11  ;;  %v368_v22 = vld [vmem:[%s3297_s29 + $0xf8] sm:$0xff] }
  0xb6   : > { %2327 = vmatprep.subr.bf16.mxu1 %v2326_v59  ;;  %v382_v20 = vld [vmem:[%s3297_s29 + $0x168] sm:$0xff]  ;;  %v399_v23 = vld [vmem:[%s3297_s29 + $0x1f0] sm:$0xff]  ;;  %v400_v24 = vld [vmem:[%s3297_s29 + $0x1f8] sm:$0xff]  ;;  %v2304_v25 = vpack.c.bf16 %v350_v17, %v349_v16  ;;  %v2306_v27 = vpack.c.bf16 %v368_v22, %v367_v21 }
  0xb7   : > { %v2336_v26 = vpack.c.bf16 %v382_v20, %v381_v18  ;;  %v351_v28 = vld [vmem:[%s3297_s29 + $0x70] sm:$0xff]  ;;  %v352_v29 = vld [vmem:[%s3297_s29 + $0x78] sm:$0xff]  ;;  %v2338_v31 = vpack.c.bf16 %v400_v24, %v399_v23  ;;  %v417_v33 = vld [vmem:[%s3297_s29 + $0x280] sm:$0xff] }
  0xb8   : > { %2297 = vmatpush3.bf16.msra.mxu0 %v2296_v1  ;;  %v383_v30 = vld [vmem:[%s3297_s29 + $0x170] sm:$0xff]  ;;  %v384_v32 = vld [vmem:[%s3297_s29 + $0x178] sm:$0xff]  ;;  %v418_v34 = vld [vmem:[%s3297_s29 + $0x288] sm:$0xff]  ;;  %v2308_v37 = vpack.c.bf16 %v352_v29, %v351_v28 }
  0xb9   : > { %2329 = vmatpush3.bf16.msra.mxu1 %v2328_v2  ;;  %2299 = vmatprep.subr.bf16.mxu0 %v2298_v3  ;;  %v449_v35 = vld [vmem:[%s3297_s29 + $0x380] sm:$0xff]  ;;  %v450_v36 = vld [vmem:[%s3297_s29 + $0x388] sm:$0xff]  ;;  %v2340_v38 = vpack.c.bf16 %v384_v32, %v383_v30  ;;  %v2342_v39 = vpack.c.bf16 %v418_v34, %v417_v33  ;;  %v419_v45 = vld [vmem:[%s3297_s29 + $0x290] sm:$0xff] }
  0xba   : > { %2331 = vmatprep.subr.bf16.mxu1 %v2330_v7  ;;  %v401_v40 = vld [vmem:[%s3297_s29 + $0x200] sm:$0xff]  ;;  %v402_v41 = vld [vmem:[%s3297_s29 + $0x208] sm:$0xff]  ;;  %v2374_v43 = vpack.c.bf16 %v450_v36, %v449_v35  ;;  %v420_v46 = vld [vmem:[%s3297_s29 + $0x298] sm:$0xff] }
  0xbb   : > { %v433_v42 = vld [vmem:[%s3297_s29 + $0x300] sm:$0xff]  ;;  %v434_v44 = vld [vmem:[%s3297_s29 + $0x308] sm:$0xff]  ;;  %v451_v47 = vld [vmem:[%s3297_s29 + $0x390] sm:$0xff]  ;;  %v2344_v51 = vpack.c.bf16 %v402_v41, %v401_v40  ;;  %v2346_v53 = vpack.c.bf16 %v420_v46, %v419_v45 }
  0xbc   : > { %2301 = vmatpush3.bf16.msra.mxu0 %v2300_v13  ;;  %v452_v48 = vld [vmem:[%s3297_s29 + $0x398] sm:$0xff]  ;;  %v312_v49 = vld [vmem:[%s3279_s7] sm:$0xff]  ;;  %v2376_v52 = vpack.c.bf16 %v434_v44, %v433_v42  ;;  %v403_v54 = vld [vmem:[%s3297_s29 + $0x210] sm:$0xff] }
  0xbd   : > { %2333 = vmatpush3.bf16.msra.mxu1 %v2332_v14  ;;  %2303 = vmatprep.subr.bf16.mxu0 %v2302_v15  ;;  %v314_v50 = vld [vmem:[%s3279_s7 + $0x10] sm:$0xff]  ;;  %v435_v56 = vld [vmem:[%s3297_s29 + $0x310] sm:$0xff]  ;;  %v2378_v57 = vpack.c.bf16 %v452_v48, %v451_v47  ;;  %v421_v59 = vld [vmem:[%s3297_s29 + $0x2a0] sm:$0xff] }
  0xbe   : > { %2335 = vmatprep.subr.bf16.mxu1 %v2334_v19  ;;  %v404_v55 = vld [vmem:[%s3297_s29 + $0x218] sm:$0xff]  ;;  %v422_v60 = vld [vmem:[%s3297_s29 + $0x2a8] sm:$0xff]  ;;  %v453_v61 = vld [vmem:[%s3297_s29 + $0x3a0] sm:$0xff] }
  0xbf   : > { %v436_v58 = vld [vmem:[%s3297_s29 + $0x318] sm:$0xff]  ;;  %v454_v62 = vld [vmem:[%s3297_s29 + $0x3a8] sm:$0xff]  ;;  %v317_v63 = vld [vmem:[%s3279_s7 + $0x28] sm:$0xff]  ;;  %v2348_v0 = vpack.c.bf16 %v404_v55, %v403_v54  ;;  %v2350_v3 = vpack.c.bf16 %v422_v60, %v421_v59 }
  0xc0   : > { %2305 = vmatpush3.bf16.msra.mxu0 %v2304_v25  ;;  %v319_v1 = vld [vmem:[%s3279_s7 + $0x38] sm:$0xff]  ;;  %v2380_v2 = vpack.c.bf16 %v436_v58, %v435_v56  ;;  %v406_v5 = vld [vmem:[%s3297_s29 + $0x228] sm:$0xff]  ;;  %v2382_v7 = vpack.c.bf16 %v454_v62, %v453_v61  ;;  %v423_v9 = vld [vmem:[%s3297_s29 + $0x2b0] sm:$0xff] }
  0xc1   : > { %2337 = vmatpush3.bf16.msra.mxu1 %v2336_v26  ;;  %2307 = vmatprep.subr.bf16.mxu0 %v2306_v27  ;;  %v405_v4 = vld [vmem:[%s3297_s29 + $0x220] sm:$0xff]  ;;  %v438_v8 = vld [vmem:[%s3297_s29 + $0x328] sm:$0xff]  ;;  %v424_v10 = vld [vmem:[%s3297_s29 + $0x2b8] sm:$0xff] }
  0xc2   : > { %2339 = vmatprep.subr.bf16.mxu1 %v2338_v31  ;;  %v437_v6 = vld [vmem:[%s3297_s29 + $0x320] sm:$0xff]  ;;  %v455_v11 = vld [vmem:[%s3297_s29 + $0x3b0] sm:$0xff]  ;;  %v456_v12 = vld [vmem:[%s3297_s29 + $0x3b8] sm:$0xff]  ;;  %v2352_v13 = vpack.c.bf16 %v406_v5, %v405_v4  ;;  %v2354_v15 = vpack.c.bf16 %v424_v10, %v423_v9 }
  0xc3   : > { %v2384_v14 = vpack.c.bf16 %v438_v8, %v437_v6  ;;  %v407_v16 = vld [vmem:[%s3297_s29 + $0x230] sm:$0xff]  ;;  %v408_v17 = vld [vmem:[%s3297_s29 + $0x238] sm:$0xff]  ;;  %v2386_v19 = vpack.c.bf16 %v456_v12, %v455_v11  ;;  %v425_v21 = vld [vmem:[%s3297_s29 + $0x2c0] sm:$0xff] }
  0xc4   : > { %2309 = vmatpush3.bf16.msra.mxu0 %v2308_v37  ;;  %v439_v18 = vld [vmem:[%s3297_s29 + $0x330] sm:$0xff]  ;;  %v440_v20 = vld [vmem:[%s3297_s29 + $0x338] sm:$0xff]  ;;  %v426_v22 = vld [vmem:[%s3297_s29 + $0x2c8] sm:$0xff]  ;;  %v2356_v25 = vpack.c.bf16 %v408_v17, %v407_v16 }
  0xc5   : > { %2341 = vmatpush3.bf16.msra.mxu1 %v2340_v38  ;;  %2343 = vmatprep.subr.bf16.mxu0 %v2342_v39  ;;  %v457_v23 = vld [vmem:[%s3297_s29 + $0x3c0] sm:$0xff]  ;;  %v458_v24 = vld [vmem:[%s3297_s29 + $0x3c8] sm:$0xff]  ;;  %v2388_v26 = vpack.c.bf16 %v440_v20, %v439_v18  ;;  %v2358_v27 = vpack.c.bf16 %v426_v22, %v425_v21  ;;  %v427_v33 = vld [vmem:[%s3297_s29 + $0x2d0] sm:$0xff] }
  0xc6   : > { %2375 = vmatprep.subr.bf16.mxu1 %v2374_v43  ;;  %v409_v28 = vld [vmem:[%s3297_s29 + $0x240] sm:$0xff]  ;;  %v410_v29 = vld [vmem:[%s3297_s29 + $0x248] sm:$0xff]  ;;  %v2390_v31 = vpack.c.bf16 %v458_v24, %v457_v23  ;;  %v428_v34 = vld [vmem:[%s3297_s29 + $0x2d8] sm:$0xff] }
  0xc7   : > { %786 = vmatmul.mubr.f32.vlgmr.msra.gmra.mrb[0].mxu0 %v312_v49  ;;  %v441_v30 = vld [vmem:[%s3297_s29 + $0x340] sm:$0xff]  ;;  %v442_v32 = vld [vmem:[%s3297_s29 + $0x348] sm:$0xff]  ;;  %v459_v35 = vld [vmem:[%s3297_s29 + $0x3d0] sm:$0xff]  ;;  %v2360_v37 = vpack.c.bf16 %v410_v29, %v409_v28  ;;  %v2362_v39 = vpack.c.bf16 %v428_v34, %v427_v33 }
  0xc8   : > { %856 = vmatmul.mubr.f32.vlgmr.msra.gmra.mrb[0].mxu1 %v314_v50  ;;  %2345 = vmatpush3.bf16.msra.mxu0 %v2344_v51  ;;  %v460_v36 = vld [vmem:[%s3297_s29 + $0x3d8] sm:$0xff]  ;;  %v2392_v38 = vpack.c.bf16 %v442_v32, %v441_v30  ;;  %v411_v40 = vld [vmem:[%s3297_s29 + $0x250] sm:$0xff]  ;;  %v429_v45 = vld [vmem:[%s3297_s29 + $0x2e0] sm:$0xff] }
  0xc9   : > { %2377 = vmatpush3.bf16.msra.mxu1 %v2376_v52  ;;  %2347 = vmatprep.subr.bf16.mxu0 %v2346_v53  ;;  %v412_v41 = vld [vmem:[%s3297_s29 + $0x258] sm:$0xff]  ;;  %v443_v42 = vld [vmem:[%s3297_s29 + $0x350] sm:$0xff]  ;;  %v2394_v43 = vpack.c.bf16 %v460_v36, %v459_v35  ;;  %v430_v46 = vld [vmem:[%s3297_s29 + $0x2e8] sm:$0xff] }
  0xca   : > { %2379 = vmatprep.subr.bf16.mxu1 %v2378_v57  ;;  %925 = vmatprep.mubr.f32.mxu0 %v317_v63  ;;  %v444_v44 = vld [vmem:[%s3297_s29 + $0x358] sm:$0xff]  ;;  %v461_v47 = vld [vmem:[%s3297_s29 + $0x3e0] sm:$0xff]  ;;  %v462_v48 = vld [vmem:[%s3297_s29 + $0x3e8] sm:$0xff]  ;;  %v2364_v49 = vpack.c.bf16 %v412_v41, %v411_v40  ;;  %v2366_v51 = vpack.c.bf16 %v430_v46, %v429_v45 }
  0xcb   : > { %995 = vmatprep.mubr.f32.mxu1 %v319_v1  ;;  %v2396_v50 = vpack.c.bf16 %v444_v44, %v443_v42  ;;  %v413_v52 = vld [vmem:[%s3297_s29 + $0x260] sm:$0xff]  ;;  %v414_v53 = vld [vmem:[%s3297_s29 + $0x268] sm:$0xff]  ;;  %v2398_v55 = vpack.c.bf16 %v462_v48, %v461_v47  ;;  %v431_v57 = vld [vmem:[%s3297_s29 + $0x2f0] sm:$0xff] }
  0xcc   : > { %2349 = vmatpush3.bf16.msra.mxu0 %v2348_v0  ;;  %v445_v54 = vld [vmem:[%s3297_s29 + $0x360] sm:$0xff]  ;;  %v446_v56 = vld [vmem:[%s3297_s29 + $0x368] sm:$0xff]  ;;  %v432_v58 = vld [vmem:[%s3297_s29 + $0x2f8] sm:$0xff]  ;;  %v2368_v61 = vpack.c.bf16 %v414_v53, %v413_v52 }
  0xcd   : > { %2381 = vmatpush3.bf16.msra.mxu1 %v2380_v2  ;;  %2351 = vmatprep.subr.bf16.mxu0 %v2350_v3  ;;  %v463_v59 = vld [vmem:[%s3297_s29 + $0x3f0] sm:$0xff]  ;;  %v464_v60 = vld [vmem:[%s3297_s29 + $0x3f8] sm:$0xff]  ;;  %v2400_v62 = vpack.c.bf16 %v446_v56, %v445_v54  ;;  %v2370_v63 = vpack.c.bf16 %v432_v58, %v431_v57  ;;  %v481_v5 = vld [vmem:[%s3297_s29 + $0x480] sm:$0xff] }
  0xce   : > { %2383 = vmatprep.subr.bf16.mxu1 %v2382_v7  ;;  %v415_v0 = vld [vmem:[%s3297_s29 + $0x270] sm:$0xff]  ;;  %v416_v1 = vld [vmem:[%s3297_s29 + $0x278] sm:$0xff]  ;;  %v2402_v3 = vpack.c.bf16 %v464_v60, %v463_v59  ;;  %v482_v6 = vld [vmem:[%s3297_s29 + $0x488] sm:$0xff] }
  0xcf   : > { %v447_v2 = vld [vmem:[%s3297_s29 + $0x370] sm:$0xff]  ;;  %v448_v4 = vld [vmem:[%s3297_s29 + $0x378] sm:$0xff]  ;;  %v513_v7 = vld [vmem:[%s3297_s29 + $0x580] sm:$0xff]  ;;  %v2372_v9 = vpack.c.bf16 %v416_v1, %v415_v0  ;;  %v2406_v11 = vpack.c.bf16 %v482_v6, %v481_v5 }
  0xd0   : > { %2353 = vmatpush3.bf16.msra.mxu0 %v2352_v13  ;;  %v514_v8 = vld [vmem:[%s3297_s29 + $0x588] sm:$0xff]  ;;  %v2404_v10 = vpack.c.bf16 %v448_v4, %v447_v2  ;;  %v465_v12 = vld [vmem:[%s3297_s29 + $0x400] sm:$0xff]  ;;  %v483_v17 = vld [vmem:[%s3297_s29 + $0x490] sm:$0xff] }
  0xd1   : > { %2385 = vmatpush3.bf16.msra.mxu1 %v2384_v14  ;;  %2355 = vmatprep.subr.bf16.mxu0 %v2354_v15  ;;  %v466_v13 = vld [vmem:[%s3297_s29 + $0x408] sm:$0xff]  ;;  %v497_v14 = vld [vmem:[%s3297_s29 + $0x500] sm:$0xff]  ;;  %v2438_v15 = vpack.c.bf16 %v514_v8, %v513_v7  ;;  %v484_v18 = vld [vmem:[%s3297_s29 + $0x498] sm:$0xff] }
  0xd2   : > { %2387 = vmatprep.subr.bf16.mxu1 %v2386_v19  ;;  %v498_v16 = vld [vmem:[%s3297_s29 + $0x508] sm:$0xff]  ;;  %v515_v19 = vld [vmem:[%s3297_s29 + $0x590] sm:$0xff]  ;;  %v516_v20 = vld [vmem:[%s3297_s29 + $0x598] sm:$0xff]  ;;  %v2408_v22 = vpack.c.bf16 %v466_v13, %v465_v12 }
  0xd3   : > { %v316_v21 = vld [vmem:[%s3279_s7 + $0x20] sm:$0xff]  ;;  %v318_v23 = vld [vmem:[%s3279_s7 + $0x30] sm:$0xff]  ;;  %v2440_v24 = vpack.c.bf16 %v498_v16, %v497_v14  ;;  %v499_v28 = vld [vmem:[%s3297_s29 + $0x510] sm:$0xff]  ;;  %v2442_v29 = vpack.c.bf16 %v516_v20, %v515_v19 }
  0xd4   : > { %2357 = vmatpush3.bf16.msra.mxu0 %v2356_v25  ;;  %v2410_v25 = vpack.c.bf16 %v484_v18, %v483_v17  ;;  %v500_v30 = vld [vmem:[%s3297_s29 + $0x518] sm:$0xff]  ;;  %v486_v32 = vld [vmem:[%s3297_s29 + $0x4a8] sm:$0xff]  ;;  %v517_v33 = vld [vmem:[%s3297_s29 + $0x5a0] sm:$0xff] }
  0xd5   : > { %2389 = vmatpush3.bf16.msra.mxu1 %v2388_v26  ;;  %2359 = vmatprep.subr.bf16.mxu0 %v2358_v27  ;;  %v467_v26 = vld [vmem:[%s3297_s29 + $0x410] sm:$0xff]  ;;  %v468_v27 = vld [vmem:[%s3297_s29 + $0x418] sm:$0xff]  ;;  %v518_v34 = vld [vmem:[%s3297_s29 + $0x5a8] sm:$0xff] }
  0xd6   : > { %2391 = vmatprep.subr.bf16.mxu1 %v2390_v31  ;;  %v485_v31 = vld [vmem:[%s3297_s29 + $0x4a0] sm:$0xff]  ;;  %v321_v35 = vld [vmem:[%s3279_s7 + $0x48] sm:$0xff]  ;;  %v2412_v36 = vpack.c.bf16 %v468_v27, %v467_v26  ;;  %v470_v41 = vld [vmem:[%s3297_s29 + $0x428] sm:$0xff] }
  0xd7   : > { %v469_v40 = vld [vmem:[%s3297_s29 + $0x420] sm:$0xff]  ;;  %v502_v44 = vld [vmem:[%s3297_s29 + $0x528] sm:$0xff]  ;;  %v487_v45 = vld [vmem:[%s3297_s29 + $0x4b0] sm:$0xff] }
  0xd8   : > { %2361 = vmatpush3.bf16.msra.mxu0 %v2360_v37  ;;  %v323_v37 = vld [vmem:[%s3279_s7 + $0x58] sm:$0xff]  ;;  %v488_v46 = vld [vmem:[%s3297_s29 + $0x4b8] sm:$0xff]  ;;  %v519_v47 = vld [vmem:[%s3297_s29 + $0x5b0] sm:$0xff] }
  0xd9   : > { %2393 = vmatpush3.bf16.msra.mxu1 %v2392_v38  ;;  %2363 = vmatprep.subr.bf16.mxu0 %v2362_v39  ;;  %v2444_v38 = vpack.c.bf16 %v500_v30, %v499_v28  ;;  %v2414_v39 = vpack.c.bf16 %v486_v32, %v485_v31  ;;  %v501_v42 = vld [vmem:[%s3297_s29 + $0x520] sm:$0xff]  ;;  %v520_v48 = vld [vmem:[%s3297_s29 + $0x5b8] sm:$0xff]  ;;  %v471_v52 = vld [vmem:[%s3297_s29 + $0x430] sm:$0xff] }
  0xda   : > { %2395 = vmatprep.subr.bf16.mxu1 %v2394_v43  ;;  %v2446_v43 = vpack.c.bf16 %v518_v34, %v517_v33  ;;  %v472_v53 = vld [vmem:[%s3297_s29 + $0x438] sm:$0xff]  ;;  %v503_v54 = vld [vmem:[%s3297_s29 + $0x530] sm:$0xff]  ;;  %v489_v57 = vld [vmem:[%s3297_s29 + $0x4c0] sm:$0xff] }
  0xdb   : > { %v504_v56 = vld [vmem:[%s3297_s29 + $0x538] sm:$0xff]  ;;  %v490_v58 = vld [vmem:[%s3297_s29 + $0x4c8] sm:$0xff]  ;;  %v521_v59 = vld [vmem:[%s3297_s29 + $0x5c0] sm:$0xff] }
  0xdc   : > { %2365 = vmatpush3.bf16.msra.mxu0 %v2364_v49  ;;  %v2416_v49 = vpack.c.bf16 %v470_v41, %v469_v40  ;;  %v522_v60 = vld [vmem:[%s3297_s29 + $0x5c8] sm:$0xff]  ;;  %v473_v0 = vld [vmem:[%s3297_s29 + $0x440] sm:$0xff]  ;;  %v491_v5 = vld [vmem:[%s3297_s29 + $0x4d0] sm:$0xff] }
  0xdd   : > { %2397 = vmatpush3.bf16.msra.mxu1 %v2396_v50  ;;  %2367 = vmatprep.subr.bf16.mxu0 %v2366_v51  ;;  %v2448_v50 = vpack.c.bf16 %v502_v44, %v501_v42  ;;  %v2418_v51 = vpack.c.bf16 %v488_v46, %v487_v45  ;;  %v474_v1 = vld [vmem:[%s3297_s29 + $0x448] sm:$0xff]  ;;  %v505_v2 = vld [vmem:[%s3297_s29 + $0x540] sm:$0xff]  ;;  %v492_v6 = vld [vmem:[%s3297_s29 + $0x4d8] sm:$0xff] }
  0xde   : > { %2399 = vmatprep.subr.bf16.mxu1 %v2398_v55  ;;  %v2450_v55 = vpack.c.bf16 %v520_v48, %v519_v47  ;;  %v506_v4 = vld [vmem:[%s3297_s29 + $0x548] sm:$0xff]  ;;  %v523_v7 = vld [vmem:[%s3297_s29 + $0x5d0] sm:$0xff]  ;;  %v524_v8 = vld [vmem:[%s3297_s29 + $0x5d8] sm:$0xff] }
  0xdf   : > { %v475_v12 = vld [vmem:[%s3297_s29 + $0x450] sm:$0xff]  ;;  %v476_v13 = vld [vmem:[%s3297_s29 + $0x458] sm:$0xff]  ;;  %v493_v17 = vld [vmem:[%s3297_s29 + $0x4e0] sm:$0xff] }
  0xe0   : > { %2369 = vmatpush3.bf16.msra.mxu0 %v2368_v61  ;;  %v2420_v61 = vpack.c.bf16 %v472_v53, %v471_v52  ;;  %v507_v14 = vld [vmem:[%s3297_s29 + $0x550] sm:$0xff]  ;;  %v508_v16 = vld [vmem:[%s3297_s29 + $0x558] sm:$0xff]  ;;  %v494_v18 = vld [vmem:[%s3297_s29 + $0x4e8] sm:$0xff] }
  0xe1   : > { %2401 = vmatpush3.bf16.msra.mxu1 %v2400_v62  ;;  %2371 = vmatprep.subr.bf16.mxu0 %v2370_v63  ;;  %v2452_v62 = vpack.c.bf16 %v504_v56, %v503_v54  ;;  %v2422_v63 = vpack.c.bf16 %v490_v58, %v489_v57  ;;  %v525_v19 = vld [vmem:[%s3297_s29 + $0x5e0] sm:$0xff]  ;;  %v526_v20 = vld [vmem:[%s3297_s29 + $0x5e8] sm:$0xff]  ;;  %v496_v30 = vld [vmem:[%s3297_s29 + $0x4f8] sm:$0xff] }
  0xe2   : > { %2403 = vmatprep.subr.bf16.mxu1 %v2402_v3  ;;  %v2454_v3 = vpack.c.bf16 %v522_v60, %v521_v59  ;;  %v509_v26 = vld [vmem:[%s3297_s29 + $0x560] sm:$0xff]  ;;  %v2462_v27 = vpack.c.bf16 %v526_v20, %v525_v19  ;;  %v510_v28 = vld [vmem:[%s3297_s29 + $0x568] sm:$0xff]  ;;  %v527_v31 = vld [vmem:[%s3297_s29 + $0x5f0] sm:$0xff] }
  0xe3   : > { %v528_v32 = vld [vmem:[%s3297_s29 + $0x5f8] sm:$0xff]  ;;  %v2464_v34 = vpack.c.bf16 %v510_v28, %v509_v26  ;;  %v545_v41 = vld [vmem:[%s3297_s29 + $0x680] sm:$0xff]  ;;  %v546_v42 = vld [vmem:[%s3297_s29 + $0x688] sm:$0xff] }
  0xe4   : > { %2373 = vmatpush3.bf16.msra.mxu0 %v2372_v9  ;;  %v2424_v9 = vpack.c.bf16 %v474_v1, %v473_v0  ;;  %v512_v40 = vld [vmem:[%s3297_s29 + $0x578] sm:$0xff]  ;;  %v578_v44 = vld [vmem:[%s3297_s29 + $0x788] sm:$0xff]  ;;  %v2470_v47 = vpack.c.bf16 %v546_v42, %v545_v41  ;;  %v529_v48 = vld [vmem:[%s3297_s29 + $0x600] sm:$0xff] }
  0xe5   : > { %2405 = vmatpush3.bf16.msra.mxu1 %v2404_v10  ;;  %2407 = vmatprep.subr.bf16.mxu0 %v2406_v11  ;;  %v2456_v10 = vpack.c.bf16 %v506_v4, %v505_v2  ;;  %v2426_v11 = vpack.c.bf16 %v492_v6, %v491_v5  ;;  %v562_v52 = vld [vmem:[%s3297_s29 + $0x708] sm:$0xff]  ;;  %v547_v53 = vld [vmem:[%s3297_s29 + $0x690] sm:$0xff]  ;;  %v548_v54 = vld [vmem:[%s3297_s29 + $0x698] sm:$0xff] }
  0xe6   : > { %2439 = vmatprep.subr.bf16.mxu1 %v2438_v15  ;;  %v2458_v15 = vpack.c.bf16 %v524_v8, %v523_v7  ;;  %v580_v56 = vld [vmem:[%s3297_s29 + $0x798] sm:$0xff]  ;;  %v320_v57 = vld [vmem:[%s3279_s7 + $0x40] sm:$0xff]  ;;  %v563_v0 = vld [vmem:[%s3297_s29 + $0x710] sm:$0xff] }
  0xe7   : > { %926 = vmatmul.mubr.f32.vlgmr.msra.gmra.mrb[2].mxu0 %v316_v21  ;;  %v2428_v21 = vpack.c.bf16 %v476_v13, %v475_v12  ;;  %v322_v59 = vld [vmem:[%s3279_s7 + $0x50] sm:$0xff]  ;;  %v550_v4 = vld [vmem:[%s3297_s29 + $0x6a8] sm:$0xff]  ;;  %v581_v5 = vld [vmem:[%s3297_s29 + $0x7a0] sm:$0xff] }
  0xe8   : > { %2409 = vmatpush3.bf16.msra.mxu0 %v2408_v22  ;;  %996 = vmatmul.mubr.f32.vlgmr.msra.gmra.mrb[2].mxu1 %v318_v23  ;;  %v2460_v22 = vpack.c.bf16 %v508_v16, %v507_v14  ;;  %v2430_v23 = vpack.c.bf16 %v494_v18, %v493_v17  ;;  %v564_v2 = vld [vmem:[%s3297_s29 + $0x718] sm:$0xff]  ;;  %v582_v6 = vld [vmem:[%s3297_s29 + $0x7a8] sm:$0xff]  ;;  %v325_v7 = vld [vmem:[%s3279_s7 + $0x68] sm:$0xff] }
  0xe9   : > { %2441 = vmatpush3.bf16.msra.mxu1 %v2440_v24  ;;  %2411 = vmatprep.subr.bf16.mxu0 %v2410_v25  ;;  %v477_v24 = vld [vmem:[%s3297_s29 + $0x460] sm:$0xff]  ;;  %v478_v25 = vld [vmem:[%s3297_s29 + $0x468] sm:$0xff]  ;;  %v551_v17 = vld [vmem:[%s3297_s29 + $0x6b0] sm:$0xff] }
  0xea   : > { %2443 = vmatprep.subr.bf16.mxu1 %v2442_v29  ;;  %1065 = vmatprep.mubr.f32.mxu0 %v321_v35  ;;  %v495_v29 = vld [vmem:[%s3297_s29 + $0x4f0] sm:$0xff]  ;;  %v2432_v33 = vpack.c.bf16 %v478_v25, %v477_v24  ;;  %v533_v12 = vld [vmem:[%s3297_s29 + $0x620] sm:$0xff]  ;;  %v534_v13 = vld [vmem:[%s3297_s29 + $0x628] sm:$0xff] }
  0xeb   : > { %1135 = vmatprep.mubr.f32.mxu1 %v323_v37  ;;  %v2434_v35 = vpack.c.bf16 %v496_v30, %v495_v29  ;;  %v480_v37 = vld [vmem:[%s3297_s29 + $0x478] sm:$0xff]  ;;  %v565_v14 = vld [vmem:[%s3297_s29 + $0x720] sm:$0xff]  ;;  %v566_v16 = vld [vmem:[%s3297_s29 + $0x728] sm:$0xff] }
  0xec   : > { %2413 = vmatpush3.bf16.msra.mxu0 %v2412_v36  ;;  %v479_v36 = vld [vmem:[%s3297_s29 + $0x470] sm:$0xff]  ;;  %v552_v18 = vld [vmem:[%s3297_s29 + $0x6b8] sm:$0xff]  ;;  %v553_v29 = vld [vmem:[%s3297_s29 + $0x6c0] sm:$0xff] }
  0xed   : > { %2445 = vmatpush3.bf16.msra.mxu1 %v2444_v38  ;;  %2415 = vmatprep.subr.bf16.mxu0 %v2414_v39  ;;  %v511_v38 = vld [vmem:[%s3297_s29 + $0x570] sm:$0xff]  ;;  %v2466_v39 = vpack.c.bf16 %v528_v32, %v527_v31  ;;  %v2436_v45 = vpack.c.bf16 %v480_v37, %v479_v36  ;;  %v584_v20 = vld [vmem:[%s3297_s29 + $0x7b8] sm:$0xff]  ;;  %v554_v30 = vld [vmem:[%s3297_s29 + $0x6c8] sm:$0xff] }
  0xee   : > { %2447 = vmatprep.subr.bf16.mxu1 %v2446_v43  ;;  %v577_v43 = vld [vmem:[%s3297_s29 + $0x780] sm:$0xff]  ;;  %v2468_v46 = vpack.c.bf16 %v512_v40, %v511_v38  ;;  %v583_v19 = vld [vmem:[%s3297_s29 + $0x7b0] sm:$0xff]  ;;  %v536_v25 = vld [vmem:[%s3297_s29 + $0x638] sm:$0xff] }
  0xef   : > { %v535_v24 = vld [vmem:[%s3297_s29 + $0x630] sm:$0xff]  ;;  %v568_v28 = vld [vmem:[%s3297_s29 + $0x738] sm:$0xff]  ;;  %v585_v31 = vld [vmem:[%s3297_s29 + $0x7c0] sm:$0xff] }
  0xf0   : > { %2417 = vmatpush3.bf16.msra.mxu0 %v2416_v49  ;;  %v530_v49 = vld [vmem:[%s3297_s29 + $0x608] sm:$0xff]  ;;  %v567_v26 = vld [vmem:[%s3297_s29 + $0x730] sm:$0xff]  ;;  %v537_v36 = vld [vmem:[%s3297_s29 + $0x640] sm:$0xff] }
  0xf1   : > { %2449 = vmatpush3.bf16.msra.mxu1 %v2448_v50  ;;  %2419 = vmatprep.subr.bf16.mxu0 %v2418_v51  ;;  %v561_v50 = vld [vmem:[%s3297_s29 + $0x700] sm:$0xff]  ;;  %v2502_v51 = vpack.c.bf16 %v578_v44, %v577_v43  ;;  %v2472_v58 = vpack.c.bf16 %v530_v49, %v529_v48  ;;  %v586_v32 = vld [vmem:[%s3297_s29 + $0x7c8] sm:$0xff]  ;;  %v555_v41 = vld [vmem:[%s3297_s29 + $0x6d0] sm:$0xff] }
  0xf2   : > { %2451 = vmatprep.subr.bf16.mxu1 %v2450_v55  ;;  %v579_v55 = vld [vmem:[%s3297_s29 + $0x790] sm:$0xff]  ;;  %v2504_v60 = vpack.c.bf16 %v562_v52, %v561_v50  ;;  %v538_v37 = vld [vmem:[%s3297_s29 + $0x648] sm:$0xff]  ;;  %v569_v38 = vld [vmem:[%s3297_s29 + $0x740] sm:$0xff] }
  0xf3   : > { %v2506_v1 = vpack.c.bf16 %v580_v56, %v579_v55  ;;  %v570_v40 = vld [vmem:[%s3297_s29 + $0x748] sm:$0xff]  ;;  %v556_v42 = vld [vmem:[%s3297_s29 + $0x6d8] sm:$0xff]  ;;  %v587_v43 = vld [vmem:[%s3297_s29 + $0x7d0] sm:$0xff] }
  0xf4   : > { %2421 = vmatpush3.bf16.msra.mxu0 %v2420_v61  ;;  %v2474_v61 = vpack.c.bf16 %v548_v54, %v547_v53  ;;  %v588_v44 = vld [vmem:[%s3297_s29 + $0x7d8] sm:$0xff]  ;;  %v539_v48 = vld [vmem:[%s3297_s29 + $0x650] sm:$0xff]  ;;  %v557_v53 = vld [vmem:[%s3297_s29 + $0x6e0] sm:$0xff] }
  0xf5   : > { %2453 = vmatpush3.bf16.msra.mxu1 %v2452_v62  ;;  %2423 = vmatprep.subr.bf16.mxu0 %v2422_v63  ;;  %v531_v62 = vld [vmem:[%s3297_s29 + $0x610] sm:$0xff]  ;;  %v532_v63 = vld [vmem:[%s3297_s29 + $0x618] sm:$0xff]  ;;  %v558_v54 = vld [vmem:[%s3297_s29 + $0x6e8] sm:$0xff] }
  0xf6   : > { %2455 = vmatprep.subr.bf16.mxu1 %v2454_v3  ;;  %v549_v3 = vld [vmem:[%s3297_s29 + $0x6a0] sm:$0xff]  ;;  %v2476_v8 = vpack.c.bf16 %v532_v63, %v531_v62  ;;  %v540_v49 = vld [vmem:[%s3297_s29 + $0x658] sm:$0xff]  ;;  %v571_v50 = vld [vmem:[%s3297_s29 + $0x750] sm:$0xff] }
  0xf7   : > { %v572_v52 = vld [vmem:[%s3297_s29 + $0x758] sm:$0xff]  ;;  %v589_v55 = vld [vmem:[%s3297_s29 + $0x7e0] sm:$0xff]  ;;  %v590_v56 = vld [vmem:[%s3297_s29 + $0x7e8] sm:$0xff] }
  0xf8   : > { %2425 = vmatpush3.bf16.msra.mxu0 %v2424_v9  ;;  %v327_v9 = vld [vmem:[%s3279_s7 + $0x78] sm:$0xff]  ;;  %v2526_v63 = vpack.c.bf16 %v590_v56, %v589_v55  ;;  %v647_v55 = vld [vmem:[%s3297_s29 + $0x9b0] sm:$0xff]  ;;  %v648_v56 = vld [vmem:[%s3297_s29 + $0x9b8] sm:$0xff] }
  0xf9   : > { %2457 = vmatpush3.bf16.msra.mxu1 %v2456_v10  ;;  %2427 = vmatprep.subr.bf16.mxu0 %v2426_v11  ;;  %v2508_v10 = vpack.c.bf16 %v564_v2, %v563_v0  ;;  %v2478_v11 = vpack.c.bf16 %v550_v4, %v549_v3  ;;  %v573_v62 = vld [vmem:[%s3297_s29 + $0x760] sm:$0xff]  ;;  %v574_v0 = vld [vmem:[%s3297_s29 + $0x768] sm:$0xff]  ;;  %v560_v2 = vld [vmem:[%s3297_s29 + $0x6f8] sm:$0xff] }
  0xfa   : > { %2459 = vmatprep.subr.bf16.mxu1 %v2458_v15  ;;  %v2510_v15 = vpack.c.bf16 %v582_v6, %v581_v5  ;;  %v591_v3 = vld [vmem:[%s3297_s29 + $0x7f0] sm:$0xff]  ;;  %v592_v4 = vld [vmem:[%s3297_s29 + $0x7f8] sm:$0xff]  ;;  %v2528_v6 = vpack.c.bf16 %v574_v0, %v573_v62 }
  0xfb   : > { %v631_v62 = vld [vmem:[%s3297_s29 + $0x930] sm:$0xff]  ;;  %v632_v0 = vld [vmem:[%s3297_s29 + $0x938] sm:$0xff] }
  0xfc   : > { %2429 = vmatpush3.bf16.msra.mxu0 %v2428_v21  ;;  %v2480_v21 = vpack.c.bf16 %v534_v13, %v533_v12  ;;  %v576_v12 = vld [vmem:[%s3297_s29 + $0x778] sm:$0xff]  ;;  %v609_v13 = vld [vmem:[%s3297_s29 + $0x880] sm:$0xff] }
  0xfd   : > { %2461 = vmatpush3.bf16.msra.mxu1 %v2460_v22  ;;  %2431 = vmatprep.subr.bf16.mxu0 %v2430_v23  ;;  %v2512_v22 = vpack.c.bf16 %v566_v16, %v565_v14  ;;  %v2482_v23 = vpack.c.bf16 %v552_v18, %v551_v17  ;;  %v610_v14 = vld [vmem:[%s3297_s29 + $0x888] sm:$0xff] }
  0xfe   : > { %2463 = vmatprep.subr.bf16.mxu1 %v2462_v27  ;;  %v2514_v27 = vpack.c.bf16 %v584_v20, %v583_v19  ;;  %v642_v16 = vld [vmem:[%s3297_s29 + $0x988] sm:$0xff]  ;;  %v2534_v19 = vpack.c.bf16 %v610_v14, %v609_v13  ;;  %v593_v20 = vld [vmem:[%s3297_s29 + $0x800] sm:$0xff]  ;;  %v619_v13 = vld [vmem:[%s3297_s29 + $0x8d0] sm:$0xff] }
  0xff   : > { %v620_v14 = vld [vmem:[%s3297_s29 + $0x8d8] sm:$0xff] }
 0x100   : > { %2433 = vmatpush3.bf16.msra.mxu0 %v2432_v33  ;;  %v2484_v33 = vpack.c.bf16 %v536_v25, %v535_v24  ;;  %v626_v24 = vld [vmem:[%s3297_s29 + $0x908] sm:$0xff]  ;;  %v611_v25 = vld [vmem:[%s3297_s29 + $0x890] sm:$0xff] }
 0x101   : > { %2465 = vmatpush3.bf16.msra.mxu1 %v2464_v34  ;;  %2435 = vmatprep.subr.bf16.mxu0 %v2434_v35  ;;  %v2516_v34 = vpack.c.bf16 %v568_v28, %v567_v26  ;;  %v2486_v35 = vpack.c.bf16 %v554_v30, %v553_v29  ;;  %v612_v26 = vld [vmem:[%s3297_s29 + $0x898] sm:$0xff]  ;;  %v324_v29 = vld [vmem:[%s3279_s7 + $0x60] sm:$0xff] }
 0x102   : > { %2467 = vmatprep.subr.bf16.mxu1 %v2466_v39  ;;  %v2518_v39 = vpack.c.bf16 %v586_v32, %v585_v31  ;;  %v644_v28 = vld [vmem:[%s3297_s29 + $0x998] sm:$0xff] }
 0x103   : > { %v326_v31 = vld [vmem:[%s3279_s7 + $0x70] sm:$0xff] }
 0x104   : > { %2437 = vmatpush3.bf16.msra.mxu0 %v2436_v45  ;;  %v2488_v45 = vpack.c.bf16 %v538_v37, %v537_v36  ;;  %v627_v36 = vld [vmem:[%s3297_s29 + $0x910] sm:$0xff] }
 0x105   : > { %2469 = vmatpush3.bf16.msra.mxu1 %v2468_v46  ;;  %2471 = vmatprep.subr.bf16.mxu0 %v2470_v47  ;;  %v2520_v46 = vpack.c.bf16 %v570_v40, %v569_v38  ;;  %v2490_v47 = vpack.c.bf16 %v556_v42, %v555_v41  ;;  %v628_v38 = vld [vmem:[%s3297_s29 + $0x918] sm:$0xff]  ;;  %v614_v40 = vld [vmem:[%s3297_s29 + $0x8a8] sm:$0xff]  ;;  %v645_v41 = vld [vmem:[%s3297_s29 + $0x9a0] sm:$0xff] }
 0x106   : > { %2503 = vmatprep.subr.bf16.mxu1 %v2502_v51  ;;  %v2522_v51 = vpack.c.bf16 %v588_v44, %v587_v43  ;;  %v646_v42 = vld [vmem:[%s3297_s29 + $0x9a8] sm:$0xff]  ;;  %v329_v43 = vld [vmem:[%s3279_s7 + $0x88] sm:$0xff] }
 0x107   : > { %1066 = vmatmul.mubr.f32.vlgmr.msra.gmra.mrb[4].mxu0 %v320_v57  ;;  %v2492_v57 = vpack.c.bf16 %v540_v49, %v539_v48  ;;  %v597_v48 = vld [vmem:[%s3297_s29 + $0x820] sm:$0xff]  ;;  %v598_v49 = vld [vmem:[%s3297_s29 + $0x828] sm:$0xff] }
 0x108   : > { %2473 = vmatpush3.bf16.msra.mxu0 %v2472_v58  ;;  %1136 = vmatmul.mubr.f32.vlgmr.msra.gmra.mrb[4].mxu1 %v322_v59  ;;  %v2524_v58 = vpack.c.bf16 %v572_v52, %v571_v50  ;;  %v2494_v59 = vpack.c.bf16 %v558_v54, %v557_v53  ;;  %v629_v50 = vld [vmem:[%s3297_s29 + $0x920] sm:$0xff]  ;;  %v630_v52 = vld [vmem:[%s3297_s29 + $0x928] sm:$0xff]  ;;  %v615_v53 = vld [vmem:[%s3297_s29 + $0x8b0] sm:$0xff] }
 0x109   : > { %2505 = vmatpush3.bf16.msra.mxu1 %v2504_v60  ;;  %2475 = vmatprep.subr.bf16.mxu0 %v2474_v61  ;;  %v541_v60 = vld [vmem:[%s3297_s29 + $0x660] sm:$0xff]  ;;  %v542_v61 = vld [vmem:[%s3297_s29 + $0x668] sm:$0xff]  ;;  %v616_v54 = vld [vmem:[%s3297_s29 + $0x8b8] sm:$0xff] }
 0x10a   : > { %2507 = vmatprep.subr.bf16.mxu1 %v2506_v1  ;;  %1205 = vmatprep.mubr.f32.mxu0 %v325_v7  ;;  %v559_v1 = vld [vmem:[%s3297_s29 + $0x6f0] sm:$0xff]  ;;  %v2496_v5 = vpack.c.bf16 %v542_v61, %v541_v60  ;;  %v600_v61 = vld [vmem:[%s3297_s29 + $0x838] sm:$0xff] }
 0x10b   : > { %1275 = vmatprep.mubr.f32.mxu1 %v327_v9  ;;  %v2498_v7 = vpack.c.bf16 %v560_v2, %v559_v1  ;;  %v544_v9 = vld [vmem:[%s3297_s29 + $0x678] sm:$0xff]  ;;  %v599_v60 = vld [vmem:[%s3297_s29 + $0x830] sm:$0xff]  ;;  %v617_v1 = vld [vmem:[%s3297_s29 + $0x8c0] sm:$0xff] }
 0x10c   : > { %2477 = vmatpush3.bf16.msra.mxu0 %v2476_v8  ;;  %v543_v8 = vld [vmem:[%s3297_s29 + $0x670] sm:$0xff]  ;;  %v618_v2 = vld [vmem:[%s3297_s29 + $0x8c8] sm:$0xff] }
 0x10d   : > { %2509 = vmatpush3.bf16.msra.mxu1 %v2508_v10  ;;  %2479 = vmatprep.subr.bf16.mxu0 %v2478_v11  ;;  %v575_v10 = vld [vmem:[%s3297_s29 + $0x770] sm:$0xff]  ;;  %v2530_v11 = vpack.c.bf16 %v592_v4, %v591_v3  ;;  %v2500_v17 = vpack.c.bf16 %v544_v9, %v543_v8  ;;  %v649_v3 = vld [vmem:[%s3297_s29 + $0x9c0] sm:$0xff]  ;;  %v650_v4 = vld [vmem:[%s3297_s29 + $0x9c8] sm:$0xff] }
 0x10e   : > { %2511 = vmatprep.subr.bf16.mxu1 %v2510_v15  ;;  %v641_v15 = vld [vmem:[%s3297_s29 + $0x980] sm:$0xff]  ;;  %v2532_v18 = vpack.c.bf16 %v576_v12, %v575_v10  ;;  %v602_v9 = vld [vmem:[%s3297_s29 + $0x848] sm:$0xff] }
 0x10f   : > { %v601_v8 = vld [vmem:[%s3297_s29 + $0x840] sm:$0xff]  ;;  %v634_v12 = vld [vmem:[%s3297_s29 + $0x948] sm:$0xff] }
 0x110   : > { %2481 = vmatpush3.bf16.msra.mxu0 %v2480_v21  ;;  %v594_v21 = vld [vmem:[%s3297_s29 + $0x808] sm:$0xff]  ;;  %v633_v10 = vld [vmem:[%s3297_s29 + $0x940] sm:$0xff] }
 0x111   : > { %2513 = vmatpush3.bf16.msra.mxu1 %v2512_v22  ;;  %2483 = vmatprep.subr.bf16.mxu0 %v2482_v23  ;;  %v625_v22 = vld [vmem:[%s3297_s29 + $0x900] sm:$0xff]  ;;  %v2566_v23 = vpack.c.bf16 %v642_v16, %v641_v15  ;;  %v2536_v30 = vpack.c.bf16 %v594_v21, %v593_v20  ;;  %v651_v15 = vld [vmem:[%s3297_s29 + $0x9d0] sm:$0xff]  ;;  %v652_v16 = vld [vmem:[%s3297_s29 + $0x9d8] sm:$0xff] }
 0x112   : > { %2515 = vmatprep.subr.bf16.mxu1 %v2514_v27  ;;  %v643_v27 = vld [vmem:[%s3297_s29 + $0x990] sm:$0xff]  ;;  %v2568_v32 = vpack.c.bf16 %v626_v24, %v625_v22  ;;  %v604_v21 = vld [vmem:[%s3297_s29 + $0x858] sm:$0xff] }
 0x113   : > { %v2570_v37 = vpack.c.bf16 %v644_v28, %v643_v27  ;;  %v603_v20 = vld [vmem:[%s3297_s29 + $0x850] sm:$0xff]  ;;  %v636_v24 = vld [vmem:[%s3297_s29 + $0x958] sm:$0xff]  ;;  %v653_v27 = vld [vmem:[%s3297_s29 + $0x9e0] sm:$0xff] }
 0x114   : > { %2485 = vmatpush3.bf16.msra.mxu0 %v2484_v33  ;;  %v2538_v33 = vpack.c.bf16 %v612_v26, %v611_v25  ;;  %v635_v22 = vld [vmem:[%s3297_s29 + $0x950] sm:$0xff]  ;;  %v621_v25 = vld [vmem:[%s3297_s29 + $0x8e0] sm:$0xff]  ;;  %v622_v26 = vld [vmem:[%s3297_s29 + $0x8e8] sm:$0xff] }
 0x115   : > { %2517 = vmatpush3.bf16.msra.mxu1 %v2516_v34  ;;  %2487 = vmatprep.subr.bf16.mxu0 %v2486_v35  ;;  %v595_v34 = vld [vmem:[%s3297_s29 + $0x810] sm:$0xff]  ;;  %v596_v35 = vld [vmem:[%s3297_s29 + $0x818] sm:$0xff]  ;;  %v654_v28 = vld [vmem:[%s3297_s29 + $0x9e8] sm:$0xff] }
 0x116   : > { %2519 = vmatprep.subr.bf16.mxu1 %v2518_v39  ;;  %v613_v39 = vld [vmem:[%s3297_s29 + $0x8a0] sm:$0xff]  ;;  %v2540_v44 = vpack.c.bf16 %v596_v35, %v595_v34  ;;  %v2590_v35 = vpack.c.bf16 %v654_v28, %v653_v27  ;;  %v711_v27 = vld [vmem:[%s3297_s29 + $0xbb0] sm:$0xff]  ;;  %v712_v28 = vld [vmem:[%s3297_s29 + $0xbb8] sm:$0xff] }
 0x117   : > { %v637_v34 = vld [vmem:[%s3297_s29 + $0x960] sm:$0xff] }
 0x118   : > { %2489 = vmatpush3.bf16.msra.mxu0 %v2488_v45  ;;  %v331_v45 = vld [vmem:[%s3279_s7 + $0x98] sm:$0xff] }
 0x119   : > { %2521 = vmatpush3.bf16.msra.mxu1 %v2520_v46  ;;  %2491 = vmatprep.subr.bf16.mxu0 %v2490_v47  ;;  %v2572_v46 = vpack.c.bf16 %v628_v38, %v627_v36  ;;  %v2542_v47 = vpack.c.bf16 %v614_v40, %v613_v39  ;;  %v638_v36 = vld [vmem:[%s3297_s29 + $0x968] sm:$0xff]  ;;  %v624_v38 = vld [vmem:[%s3297_s29 + $0x8f8] sm:$0xff]  ;;  %v655_v39 = vld [vmem:[%s3297_s29 + $0x9f0] sm:$0xff] }
 0x11a   : > { %2523 = vmatprep.subr.bf16.mxu1 %v2522_v51  ;;  %v2574_v51 = vpack.c.bf16 %v646_v42, %v645_v41  ;;  %v656_v40 = vld [vmem:[%s3297_s29 + $0x9f8] sm:$0xff]  ;;  %v2592_v42 = vpack.c.bf16 %v638_v36, %v637_v34  ;;  %v695_v34 = vld [vmem:[%s3297_s29 + $0xb30] sm:$0xff] }
 0x11b   : > { %v696_v36 = vld [vmem:[%s3297_s29 + $0xb38] sm:$0xff] }
 0x11c   : > { %2493 = vmatpush3.bf16.msra.mxu0 %v2492_v57  ;;  %v2544_v57 = vpack.c.bf16 %v598_v49, %v597_v48  ;;  %v640_v48 = vld [vmem:[%s3297_s29 + $0x978] sm:$0xff]  ;;  %v673_v49 = vld [vmem:[%s3297_s29 + $0xa80] sm:$0xff] }
 0x11d   : > { %2525 = vmatpush3.bf16.msra.mxu1 %v2524_v58  ;;  %2495 = vmatprep.subr.bf16.mxu0 %v2494_v59  ;;  %v2576_v58 = vpack.c.bf16 %v630_v52, %v629_v50  ;;  %v2546_v59 = vpack.c.bf16 %v616_v54, %v615_v53  ;;  %v674_v50 = vld [vmem:[%s3297_s29 + $0xa88] sm:$0xff] }
 0x11e   : > { %2527 = vmatprep.subr.bf16.mxu1 %v2526_v63  ;;  %v2578_v63 = vpack.c.bf16 %v648_v56, %v647_v55  ;;  %v706_v52 = vld [vmem:[%s3297_s29 + $0xb88] sm:$0xff]  ;;  %v2598_v55 = vpack.c.bf16 %v674_v50, %v673_v49  ;;  %v657_v56 = vld [vmem:[%s3297_s29 + $0xa00] sm:$0xff]  ;;  %v683_v49 = vld [vmem:[%s3297_s29 + $0xad0] sm:$0xff] }
 0x11f   : > { %v684_v50 = vld [vmem:[%s3297_s29 + $0xad8] sm:$0xff] }
 0x120   : > { %2497 = vmatpush3.bf16.msra.mxu0 %v2496_v5  ;;  %v2548_v5 = vpack.c.bf16 %v600_v61, %v599_v60  ;;  %v690_v60 = vld [vmem:[%s3297_s29 + $0xb08] sm:$0xff]  ;;  %v675_v61 = vld [vmem:[%s3297_s29 + $0xa90] sm:$0xff] }
 0x121   : > { %2529 = vmatpush3.bf16.msra.mxu1 %v2528_v6  ;;  %2499 = vmatprep.subr.bf16.mxu0 %v2498_v7  ;;  %v2580_v6 = vpack.c.bf16 %v632_v0, %v631_v62  ;;  %v2550_v7 = vpack.c.bf16 %v618_v2, %v617_v1  ;;  %v676_v62 = vld [vmem:[%s3297_s29 + $0xa98] sm:$0xff]  ;;  %v328_v1 = vld [vmem:[%s3279_s7 + $0x80] sm:$0xff] }
 0x122   : > { %2531 = vmatprep.subr.bf16.mxu1 %v2530_v11  ;;  %v2582_v11 = vpack.c.bf16 %v650_v4, %v649_v3  ;;  %v708_v0 = vld [vmem:[%s3297_s29 + $0xb98] sm:$0xff] }
 0x123   : > { %v330_v3 = vld [vmem:[%s3279_s7 + $0x90] sm:$0xff] }
 0x124   : > { %2501 = vmatpush3.bf16.msra.mxu0 %v2500_v17  ;;  %v2552_v17 = vpack.c.bf16 %v602_v9, %v601_v8  ;;  %v691_v8 = vld [vmem:[%s3297_s29 + $0xb10] sm:$0xff] }
 0x125   : > { %2533 = vmatpush3.bf16.msra.mxu1 %v2532_v18  ;;  %2535 = vmatprep.subr.bf16.mxu0 %v2534_v19  ;;  %v2584_v18 = vpack.c.bf16 %v634_v12, %v633_v10  ;;  %v2554_v19 = vpack.c.bf16 %v620_v14, %v619_v13  ;;  %v692_v10 = vld [vmem:[%s3297_s29 + $0xb18] sm:$0xff]  ;;  %v678_v12 = vld [vmem:[%s3297_s29 + $0xaa8] sm:$0xff]  ;;  %v709_v13 = vld [vmem:[%s3297_s29 + $0xba0] sm:$0xff] }
 0x126   : > { %2567 = vmatprep.subr.bf16.mxu1 %v2566_v23  ;;  %v2586_v23 = vpack.c.bf16 %v652_v16, %v651_v15  ;;  %v710_v14 = vld [vmem:[%s3297_s29 + $0xba8] sm:$0xff]  ;;  %v333_v15 = vld [vmem:[%s3279_s7 + $0xa8] sm:$0xff] }
 0x127   : > { %1206 = vmatmul.mubr.f32.vlgmr.msra.gmra.mrb[6].mxu0 %v324_v29  ;;  %v2556_v29 = vpack.c.bf16 %v604_v21, %v603_v20  ;;  %v661_v20 = vld [vmem:[%s3297_s29 + $0xa20] sm:$0xff]  ;;  %v662_v21 = vld [vmem:[%s3297_s29 + $0xa28] sm:$0xff] }
 0x128   : > { %2537 = vmatpush3.bf16.msra.mxu0 %v2536_v30  ;;  %1276 = vmatmul.mubr.f32.vlgmr.msra.gmra.mrb[6].mxu1 %v326_v31  ;;  %v2588_v30 = vpack.c.bf16 %v636_v24, %v635_v22  ;;  %v2558_v31 = vpack.c.bf16 %v622_v26, %v621_v25  ;;  %v693_v22 = vld [vmem:[%s3297_s29 + $0xb20] sm:$0xff]  ;;  %v694_v24 = vld [vmem:[%s3297_s29 + $0xb28] sm:$0xff]  ;;  %v679_v25 = vld [vmem:[%s3297_s29 + $0xab0] sm:$0xff] }
 0x129   : > { %2569 = vmatpush3.bf16.msra.mxu1 %v2568_v32  ;;  %2539 = vmatprep.subr.bf16.mxu0 %v2538_v33  ;;  %v605_v32 = vld [vmem:[%s3297_s29 + $0x860] sm:$0xff]  ;;  %v606_v33 = vld [vmem:[%s3297_s29 + $0x868] sm:$0xff]  ;;  %v680_v26 = vld [vmem:[%s3297_s29 + $0xab8] sm:$0xff] }
 0x12a   : > { %2571 = vmatprep.subr.bf16.mxu1 %v2570_v37  ;;  %1345 = vmatprep.mubr.f32.mxu0 %v329_v43  ;;  %v623_v37 = vld [vmem:[%s3297_s29 + $0x8f0] sm:$0xff]  ;;  %v2560_v41 = vpack.c.bf16 %v606_v33, %v605_v32  ;;  %v664_v33 = vld [vmem:[%s3297_s29 + $0xa38] sm:$0xff] }
 0x12b   : > { %1415 = vmatprep.mubr.f32.mxu1 %v331_v45  ;;  %v2562_v43 = vpack.c.bf16 %v624_v38, %v623_v37  ;;  %v608_v45 = vld [vmem:[%s3297_s29 + $0x878] sm:$0xff]  ;;  %v663_v32 = vld [vmem:[%s3297_s29 + $0xa30] sm:$0xff]  ;;  %v681_v37 = vld [vmem:[%s3297_s29 + $0xac0] sm:$0xff] }
 0x12c   : > { %2541 = vmatpush3.bf16.msra.mxu0 %v2540_v44  ;;  %v607_v44 = vld [vmem:[%s3297_s29 + $0x870] sm:$0xff]  ;;  %v682_v38 = vld [vmem:[%s3297_s29 + $0xac8] sm:$0xff] }
 0x12d   : > { %2573 = vmatpush3.bf16.msra.mxu1 %v2572_v46  ;;  %2543 = vmatprep.subr.bf16.mxu0 %v2542_v47  ;;  %v639_v46 = vld [vmem:[%s3297_s29 + $0x970] sm:$0xff]  ;;  %v2594_v47 = vpack.c.bf16 %v656_v40, %v655_v39  ;;  %v2564_v53 = vpack.c.bf16 %v608_v45, %v607_v44  ;;  %v713_v39 = vld [vmem:[%s3297_s29 + $0xbc0] sm:$0xff]  ;;  %v714_v40 = vld [vmem:[%s3297_s29 + $0xbc8] sm:$0xff] }
 0x12e   : > { %2575 = vmatprep.subr.bf16.mxu1 %v2574_v51  ;;  %v705_v51 = vld [vmem:[%s3297_s29 + $0xb80] sm:$0xff]  ;;  %v2596_v54 = vpack.c.bf16 %v640_v48, %v639_v46  ;;  %v666_v45 = vld [vmem:[%s3297_s29 + $0xa48] sm:$0xff] }
 0x12f   : > { %v665_v44 = vld [vmem:[%s3297_s29 + $0xa40] sm:$0xff]  ;;  %v698_v48 = vld [vmem:[%s3297_s29 + $0xb48] sm:$0xff] }
 0x130   : > { %2545 = vmatpush3.bf16.msra.mxu0 %v2544_v57  ;;  %v658_v57 = vld [vmem:[%s3297_s29 + $0xa08] sm:$0xff]  ;;  %v697_v46 = vld [vmem:[%s3297_s29 + $0xb40] sm:$0xff] }
 0x131   : > { %2577 = vmatpush3.bf16.msra.mxu1 %v2576_v58  ;;  %2547 = vmatprep.subr.bf16.mxu0 %v2546_v59  ;;  %v689_v58 = vld [vmem:[%s3297_s29 + $0xb00] sm:$0xff]  ;;  %v2630_v59 = vpack.c.bf16 %v706_v52, %v705_v51  ;;  %v2600_v2 = vpack.c.bf16 %v658_v57, %v657_v56  ;;  %v715_v51 = vld [vmem:[%s3297_s29 + $0xbd0] sm:$0xff]  ;;  %v716_v52 = vld [vmem:[%s3297_s29 + $0xbd8] sm:$0xff] }
 0x132   : > { %2579 = vmatprep.subr.bf16.mxu1 %v2578_v63  ;;  %v707_v63 = vld [vmem:[%s3297_s29 + $0xb90] sm:$0xff]  ;;  %v2632_v4 = vpack.c.bf16 %v690_v60, %v689_v58  ;;  %v668_v57 = vld [vmem:[%s3297_s29 + $0xa58] sm:$0xff] }
 0x133   : > { %v2634_v9 = vpack.c.bf16 %v708_v0, %v707_v63  ;;  %v667_v56 = vld [vmem:[%s3297_s29 + $0xa50] sm:$0xff]  ;;  %v700_v60 = vld [vmem:[%s3297_s29 + $0xb58] sm:$0xff]  ;;  %v717_v63 = vld [vmem:[%s3297_s29 + $0xbe0] sm:$0xff] }
 0x134   : > { %2549 = vmatpush3.bf16.msra.mxu0 %v2548_v5  ;;  %v2602_v5 = vpack.c.bf16 %v676_v62, %v675_v61  ;;  %v699_v58 = vld [vmem:[%s3297_s29 + $0xb50] sm:$0xff]  ;;  %v685_v61 = vld [vmem:[%s3297_s29 + $0xae0] sm:$0xff]  ;;  %v686_v62 = vld [vmem:[%s3297_s29 + $0xae8] sm:$0xff] }
 0x135   : > { %2581 = vmatpush3.bf16.msra.mxu1 %v2580_v6  ;;  %2551 = vmatprep.subr.bf16.mxu0 %v2550_v7  ;;  %v659_v6 = vld [vmem:[%s3297_s29 + $0xa10] sm:$0xff]  ;;  %v660_v7 = vld [vmem:[%s3297_s29 + $0xa18] sm:$0xff]  ;;  %v718_v0 = vld [vmem:[%s3297_s29 + $0xbe8] sm:$0xff] }
 0x136   : > { %2583 = vmatprep.subr.bf16.mxu1 %v2582_v11  ;;  %v677_v11 = vld [vmem:[%s3297_s29 + $0xaa0] sm:$0xff]  ;;  %v2604_v16 = vpack.c.bf16 %v660_v7, %v659_v6  ;;  %v2654_v7 = vpack.c.bf16 %v718_v0, %v717_v63 }
 0x137   : > { %v701_v6 = vld [vmem:[%s3297_s29 + $0xb60] sm:$0xff] }
 0x138   : > { %2553 = vmatpush3.bf16.msra.mxu0 %v2552_v17  ;;  %v335_v17 = vld [vmem:[%s3279_s7 + $0xb8] sm:$0xff] }
 0x139   : > { %2585 = vmatpush3.bf16.msra.mxu1 %v2584_v18  ;;  %2555 = vmatprep.subr.bf16.mxu0 %v2554_v19  ;;  %v2636_v18 = vpack.c.bf16 %v692_v10, %v691_v8  ;;  %v2606_v19 = vpack.c.bf16 %v678_v12, %v677_v11  ;;  %v702_v8 = vld [vmem:[%s3297_s29 + $0xb68] sm:$0xff]  ;;  %v688_v10 = vld [vmem:[%s3297_s29 + $0xaf8] sm:$0xff]  ;;  %v719_v11 = vld [vmem:[%s3297_s29 + $0xbf0] sm:$0xff] }
 0x13a   : > { %2587 = vmatprep.subr.bf16.mxu1 %v2586_v23  ;;  %v2638_v23 = vpack.c.bf16 %v710_v14, %v709_v13  ;;  %v720_v12 = vld [vmem:[%s3297_s29 + $0xbf8] sm:$0xff]  ;;  %v2656_v14 = vpack.c.bf16 %v702_v8, %v701_v6 }
 0x13c   : > { %2557 = vmatpush3.bf16.msra.mxu0 %v2556_v29  ;;  %v2608_v29 = vpack.c.bf16 %v662_v21, %v661_v20  ;;  %v704_v20 = vld [vmem:[%s3297_s29 + $0xb78] sm:$0xff] }
 0x13d   : > { %2589 = vmatpush3.bf16.msra.mxu1 %v2588_v30  ;;  %2559 = vmatprep.subr.bf16.mxu0 %v2558_v31  ;;  %v2640_v30 = vpack.c.bf16 %v694_v24, %v693_v22  ;;  %v2610_v31 = vpack.c.bf16 %v680_v26, %v679_v25  ;;  %v334_v24 = vld [vmem:[%s3279_s7 + $0xb0] sm:$0xff] }
 0x13e   : > { %2591 = vmatprep.subr.bf16.mxu1 %v2590_v35  ;;  %v2642_v35 = vpack.c.bf16 %v712_v28, %v711_v27 }
 0x140   : > { %2561 = vmatpush3.bf16.msra.mxu0 %v2560_v41  ;;  %v2612_v41 = vpack.c.bf16 %v664_v33, %v663_v32 }
 0x141   : > { %2593 = vmatpush3.bf16.msra.mxu1 %v2592_v42  ;;  %2563 = vmatprep.subr.bf16.mxu0 %v2562_v43  ;;  %v2644_v42 = vpack.c.bf16 %v696_v36, %v695_v34  ;;  %v2614_v43 = vpack.c.bf16 %v682_v38, %v681_v37 }
 0x142   : > { %2595 = vmatprep.subr.bf16.mxu1 %v2594_v47  ;;  %v2646_v47 = vpack.c.bf16 %v714_v40, %v713_v39 }
 0x144   : > { %2565 = vmatpush3.bf16.msra.mxu0 %v2564_v53  ;;  %v2616_v53 = vpack.c.bf16 %v666_v45, %v665_v44 }
 0x145   : > { %2597 = vmatpush3.bf16.msra.mxu1 %v2596_v54  ;;  %2599 = vmatprep.subr.bf16.mxu0 %v2598_v55  ;;  %v2648_v54 = vpack.c.bf16 %v698_v48, %v697_v46  ;;  %v2618_v55 = vpack.c.bf16 %v684_v50, %v683_v49 }
 0x146   : > { %2631 = vmatprep.subr.bf16.mxu1 %v2630_v59  ;;  %v2650_v59 = vpack.c.bf16 %v716_v52, %v715_v51 }
 0x147   : > { %1346 = vmatmul.mubr.f32.vlgmr.msra.gmra.mrb[8].mxu0 %v328_v1  ;;  %v2620_v1 = vpack.c.bf16 %v668_v57, %v667_v56 }
 0x148   : > { %2601 = vmatpush3.bf16.msra.mxu0 %v2600_v2  ;;  %1416 = vmatmul.mubr.f32.vlgmr.msra.gmra.mrb[8].mxu1 %v330_v3  ;;  %v2652_v2 = vpack.c.bf16 %v700_v60, %v699_v58  ;;  %v2622_v3 = vpack.c.bf16 %v686_v62, %v685_v61 }
 0x149   : > { %2633 = vmatpush3.bf16.msra.mxu1 %v2632_v4  ;;  %2603 = vmatprep.subr.bf16.mxu0 %v2602_v5  ;;  %v669_v4 = vld [vmem:[%s3297_s29 + $0xa60] sm:$0xff]  ;;  %v670_v5 = vld [vmem:[%s3297_s29 + $0xa68] sm:$0xff] }
 0x14a   : > { %2635 = vmatprep.subr.bf16.mxu1 %v2634_v9  ;;  %1485 = vmatprep.mubr.f32.mxu0 %v333_v15  ;;  %v687_v9 = vld [vmem:[%s3297_s29 + $0xaf0] sm:$0xff]  ;;  %v2624_v13 = vpack.c.bf16 %v670_v5, %v669_v4 }
 0x14b   : > { %1555 = vmatprep.mubr.f32.mxu1 %v335_v17  ;;  %v2626_v15 = vpack.c.bf16 %v688_v10, %v687_v9  ;;  %v672_v17 = vld [vmem:[%s3297_s29 + $0xa78] sm:$0xff]  ;;  %v1577_v10 = vld [vmem:[#allocation9] sm:$0xff] (!%p1798_p0) }
 0x14c   : > { %2605 = vmatpush3.bf16.msra.mxu0 %v2604_v16  ;;  %v671_v16 = vld [vmem:[%s3297_s29 + $0xa70] sm:$0xff] }
 0x14d   : > { %2637 = vmatpush3.bf16.msra.mxu1 %v2636_v18  ;;  %2607 = vmatprep.subr.bf16.mxu0 %v2606_v19  ;;  %v2658_v18 = vpack.c.bf16 %v720_v12, %v719_v11  ;;  %v703_v19 = vld [vmem:[%s3297_s29 + $0xb70] sm:$0xff]  ;;  %v2628_v21 = vpack.c.bf16 %v672_v17, %v671_v16  ;;  %v1579_v12 = vld [vmem:[#allocation9 + $0x10] sm:$0xff] (!%p1798_p0)  ;;  %v3039_v16 = vmov (!%p1798_p0), 0.0  }
 0x14e   : > { %2639 = vmatprep.subr.bf16.mxu1 %v2638_v23  ;;  %v2660_v22 = vpack.c.bf16 %v704_v20, %v703_v19  ;;  %v332_v23 = vld [vmem:[%s3279_s7 + $0xa0] sm:$0xff]  ;;  %v1578_v11 = vld [vmem:[#allocation9 + $0x8] sm:$0xff] (!%p1798_p0) }
 0x14f   : > { %v1582_v19 = vld [vmem:[#allocation9 + $0x28] sm:$0xff] (!%p1798_p0) }
 0x150   : > { %2609 = vmatpush3.bf16.msra.mxu0 %v2608_v29 }
 0x151   : > { %2641 = vmatpush3.bf16.msra.mxu1 %v2640_v30  ;;  %2611 = vmatprep.subr.bf16.mxu0 %v2610_v31 }
 0x152   : > { %2643 = vmatprep.subr.bf16.mxu1 %v2642_v35 }
 0x154   : > { %2613 = vmatpush3.bf16.msra.mxu0 %v2612_v41 }
 0x155   : > { %2645 = vmatpush3.bf16.msra.mxu1 %v2644_v42  ;;  %2615 = vmatprep.subr.bf16.mxu0 %v2614_v43 }
 0x156   : > { %2647 = vmatprep.subr.bf16.mxu1 %v2646_v47 }
 0x158   : > { %2617 = vmatpush3.bf16.msra.mxu0 %v2616_v53 }
 0x159   : > { %2649 = vmatpush3.bf16.msra.mxu1 %v2648_v54  ;;  %2619 = vmatprep.subr.bf16.mxu0 %v2618_v55 }
 0x15a   : > { %2651 = vmatprep.subr.bf16.mxu1 %v2650_v59 }
 0x15c   : > { %2621 = vmatpush3.bf16.msra.mxu0 %v2620_v1 }
 0x15d   : > { %2653 = vmatpush3.bf16.msra.mxu1 %v2652_v2  ;;  %2623 = vmatprep.subr.bf16.mxu0 %v2622_v3 }
 0x15e   : > { %2655 = vmatprep.subr.bf16.mxu1 %v2654_v7  ;;  %v311_v7 = vld [vmem:[#allocation2] sm:$0xff] }
 0x160   : > { %2625 = vmatpush3.bf16.msra.mxu0 %v2624_v13  ;;  %v3037_v13 = vmov (!%p1798_p0), 0.0|0.0  }
 0x161   : > { %2657 = vmatpush3.bf16.msra.mxu1 %v2656_v14  ;;  %2627 = vmatprep.subr.bf16.mxu0 %v2626_v15  ;;  %v2663_v14 = vpack.c.bf16 (!%p1798_p0), %v1578_v11, %v1577_v10  ;;  %v1580_v15 = vld [vmem:[#allocation9 + $0x18] sm:$0xff] (!%p1798_p0) }
 0x162   : > { %2659 = vmatprep.subr.bf16.mxu1 %v2658_v18  ;;  %v2666_v17 = vpack.c.bf16 (!%p1798_p0), %v1580_v15, %v1579_v12  ;;  %v1581_v18 = vld [vmem:[#allocation9 + $0x20] sm:$0xff] (!%p1798_p0) }
 0x163   : > { %v2669_v20 = vpack.c.bf16 (!%p1798_p0), %v1582_v19, %v1581_v18 }
 0x164   : > { %2629 = vmatpush3.bf16.msra.mxu0 %v2628_v21  ;;  %v1583_v21 = vld [vmem:[#allocation9 + $0x30] sm:$0xff] (!%p1798_p0) }
 0x165   : > { %2661 = vmatpush3.bf16.msra.mxu1 %v2660_v22  ;;  %2662 = vmatprep.subr.bf16.mxu0 (!%p1798_p0), %v3037_v13  ;;  %v1584_v22 = vld [vmem:[#allocation9 + $0x38] sm:$0xff] (!%p1798_p0) }
 0x167   : > { %1486 = vmatmul.mubr.f32.vlgmr.msra.gmra.mrb[10].mxu0 %v332_v23  ;;  %v2672_v23 = vpack.c.bf16 (!%p1798_p0), %v1584_v22, %v1583_v21 }
 0x168   : > { %1556 = vmatmul.mubr.f32.vlgmr.msra.gmra.mrb[10].mxu1 %v334_v24  ;;  %2275 = vmatprep.mubr.msk.f32.mxu0 (!%p1798_p0), %vm3038_vm0, %v3039_v16  ;;  %v1585_v24 = vld [vmem:[#allocation9 + $0x40] sm:$0xff] (!%p1798_p0) }
 0x169   : > { %2664 = vmatpush3.bf16.msra.mxu0 (!%p1798_p0), %v2663_v14 }
 0x16a   : > { %2665 = vmatprep.subr.bf16.mxu0 (!%p1798_p0), %v3037_v13 }
 0x16d   : > { %2667 = vmatpush3.bf16.msra.mxu0 (!%p1798_p0), %v2666_v17 }
 0x16e   : > { %2668 = vmatprep.subr.bf16.mxu0 (!%p1798_p0), %v3037_v13 }
 0x171   : > { %2670 = vmatpush3.bf16.msra.mxu0 (!%p1798_p0), %v2669_v20 }
 0x172   : > { %2671 = vmatprep.subr.bf16.mxu0 (!%p1798_p0), %v3037_v13 }
 0x175   : > { %2673 = vmatpush3.bf16.msra.mxu0 (!%p1798_p0), %v2672_v23 }
 0x176   : > { %2674 = vmatprep.subr.bf16.mxu0 (!%p1798_p0), %v3037_v13 }
 0x19a   : > { %v1838_v25 = vpop.f32.mrb[0].mxu0 }
 0x19b   : > { %v1873_v26 = vpop.f32.mrb[0].mxu1  ;;  %v1839_v27 = vpop.f32.mrb[1].mxu0 }
 0x19c   : > { %v1840_v28 = vadd.f32 %v1839_v27, %v1838_v25  ;;  %v1874_v29 = vpop.f32.mrb[1].mxu1  ;;  %v1586_v25 = vld [vmem:[#allocation9 + $0x48] sm:$0xff] (!%p1798_p0)  ;;  %v1587_v27 = vld [vmem:[#allocation9 + $0x50] sm:$0xff] (!%p1798_p0) }
 0x19d   : > { %v1875_v30 = vadd.f32 %v1874_v29, %v1873_v26  ;;  %v2675_v26 = vpack.c.bf16 (!%p1798_p0), %v1586_v25, %v1585_v24 }
 0x19f   : > { %v858_v31 = vadd.f32 %v1875_v30, %v1840_v28  ;;  %v1588_v28 = vld [vmem:[#allocation9 + $0x58] sm:$0xff] (!%p1798_p0)  ;;  %2676 = vmatpush3.bf16.msra.mxu0 (!%p1798_p0), %v2675_v26  ;;  %v1589_v30 = vld [vmem:[#allocation9 + $0x60] sm:$0xff] (!%p1798_p0) }
 0x1a0   : > { %v2678_v29 = vpack.c.bf16 (!%p1798_p0), %v1588_v28, %v1587_v27  ;;  %2677 = vmatprep.subr.bf16.mxu0 (!%p1798_p0), %v3037_v13 }
 0x1a3   : > { %2679 = vmatpush3.bf16.msra.mxu0 (!%p1798_p0), %v2678_v29 }
 0x1a4   : > { %2680 = vmatprep.subr.bf16.mxu0 (!%p1798_p0), %v3037_v13 }
 0x1ba   : > { %v1908_v32 = vpop.f32.mrb[2].mxu0 }
 0x1bb   : > { %v1909_v33 = vpop.f32.mrb[3].mxu0  ;;  %v1943_v34 = vpop.f32.mrb[2].mxu1 }
 0x1bc   : > { %v1910_v35 = vadd.f32 %v1909_v33, %v1908_v32  ;;  %v1944_v36 = vpop.f32.mrb[3].mxu1 }
 0x1bd   : > { %v1945_v37 = vadd.f32 %v1944_v36, %v1943_v34  ;;  %v1799_v34 = vld [vmem:[#allocation8] ss:$0 sm:$0xff] (!%p1798_p0) }
 0x1be   : > { %v928_v38 = vadd.f32 %v1910_v35, %v858_v31  ;;  %v1590_v31 = vld [vmem:[#allocation9 + $0x68] sm:$0xff] (!%p1798_p0)  ;;  %v1591_v35 = vld [vmem:[#allocation9 + $0x70] sm:$0xff] (!%p1798_p0)  ;;  %v1592_v36 = vld [vmem:[#allocation9 + $0x78] sm:$0xff] (!%p1798_p0) }
 0x1bf   : > { %v2681_v32 = vpack.c.bf16 (!%p1798_p0), %v1590_v31, %v1589_v30 }
 0x1c0   : > { %v998_v39 = vadd.f32 %v1945_v37, %v928_v38  ;;  %v2684_v38 = vpack.c.bf16 (!%p1798_p0), %v1592_v36, %v1591_v35 }
 0x1c1   : > { %2682 = vmatpush3.bf16.msra.mxu0 (!%p1798_p0), %v2681_v32 }
 0x1c2   : > { %2683 = vmatprep.subr.bf16.mxu0 (!%p1798_p0), %v3037_v13 }
 0x1c5   : > { %2685 = vmatpush3.bf16.msra.mxu0 (!%p1798_p0), %v2684_v38 }
 0x1da   : > { %v1978_v40 = vpop.f32.mrb[4].mxu0 }
 0x1db   : > { %v1979_v41 = vpop.f32.mrb[5].mxu0  ;;  %v2013_v42 = vpop.f32.mrb[4].mxu1 }
 0x1dc   : > { %v1980_v43 = vadd.f32 %v1979_v41, %v1978_v40  ;;  %v2014_v44 = vpop.f32.mrb[5].mxu1  ;;  %v1800_v40 = vld [vmem:[#allocation11] ss:$0 sm:$0xff] (!%p1798_p0) }
 0x1dd   : > { %v2015_v45 = vadd.f32 %v2014_v44, %v2013_v42 }
 0x1de   : > { %v1068_v46 = vadd.f32 %v1980_v43, %v998_v39 }
 0x1e0   : > { %v1138_v47 = vadd.f32 %v2015_v45, %v1068_v46 }
 0x1fa   : > { %v2048_v48 = vpop.f32.mrb[6].mxu0 }
 0x1fb   : > { %v2049_v49 = vpop.f32.mrb[7].mxu0  ;;  %v2083_v50 = vpop.f32.mrb[6].mxu1 }
 0x1fc   : > { %v2050_v51 = vadd.f32 %v2049_v49, %v2048_v48  ;;  %v2084_v52 = vpop.f32.mrb[7].mxu1 }
 0x1fd   : > { %v2085_v53 = vadd.f32 %v2084_v52, %v2083_v50 }
 0x1fe   : > { %v1208_v54 = vadd.f32 %v2050_v51, %v1138_v47 }
 0x200   : > { %v1278_v55 = vadd.f32 %v2085_v53, %v1208_v54 }
 0x21a   : > { %v2118_v56 = vpop.f32.mrb[8].mxu0 }
 0x21b   : > { %v2119_v57 = vpop.f32.mrb[9].mxu0  ;;  %v2153_v58 = vpop.f32.mrb[8].mxu1 }
 0x21c   : > { %v2120_v59 = vadd.f32 %v2119_v57, %v2118_v56  ;;  %v2154_v60 = vpop.f32.mrb[9].mxu1 }
 0x21d   : > { %v2155_v61 = vadd.f32 %v2154_v60, %v2153_v58 }
 0x21e   : > { %v1348_v62 = vadd.f32 %v2120_v59, %v1278_v55 }
 0x220   : > { %v1418_v63 = vadd.f32 %v2155_v61, %v1348_v62 }
 0x23a   : > { %v2188_v0 = vpop.f32.mrb[10].mxu0 }
 0x23b   : > { %v2189_v1 = vpop.f32.mrb[11].mxu0  ;;  %v2223_v2 = vpop.f32.mrb[10].mxu1 }
 0x23c   : > { %v2190_v3 = vadd.f32 %v2189_v1, %v2188_v0  ;;  %v2224_v4 = vpop.f32.mrb[11].mxu1 }
 0x23d   : > { %v2225_v5 = vadd.f32 %v2224_v4, %v2223_v2 }
 0x23e   : > { %v1488_v6 = vadd.f32 %v2190_v3, %v1418_v63  ;;  %1566 = sbr.rel (%p1798_p0) target bundleno = 807 (0x327), region = 68 }
 0x240   : > { %v1558_v8 = vadd.f32 %v2225_v5, %v1488_v6 }
 0x242   : > { %v1561_v9 = vadd.f32 %v1558_v8, %v311_v7 }
 0x244   : > { %1562 = vst [vmem:[#allocation2] sm:$0xff] %v1561_v9 }
 0x24b   : > { %v1567_v33 = vld [vmem:[#allocation2] sm:$0xff] }
 0x24c   : > { %v1575_v37 = vadd.f32 %v1799_v34, %v1567_v33 }
 0x24e   : > { %v1576_v39 = vmax.f32 %v1575_v37, 0.0 }
 0x250   : > { %2276 = vmatmul.mubr.f32.vlgmr.msra.gmra.mrb[0].mxu0 %v1576_v39 }
 0x323   : > { %v1666_v41 = vpop.f32.mrb[0].mxu0 }
 0x324   : > { %v1667_v42 = vadd.f32 %v1800_v40, %v1666_v41  ;;  %v2277_v43 = vpop.f32.mrb[1].mxu0 }
 0x326   : > { %1670 = vst [vmem:[#allocation12] sm:$0xff] %v1667_v42 }
 0x327 PF: > { %p3708_p3 = scmp.eq.s32.totalorder %s1784_s24, 3  ;;  %s3040_s25 = smov [#allocation12]  }
 0x328   : > { %s1680_s15 = sshll.u32 %s3040_s25, 4  ;;  %s1681_s15 = int_to_ptr.vmem [resolvable:$true] %s1680_s15 }
 0x329   : > { %s2939_s18 = scalar_lea.vmem %s1681_s15, 128  ;;  %p2946_p4 = scmp.lt.s32.totalorder %s1681_s15, %s1681_s15 }
 0x32a   : > { %p2940_p12 = scmp.ne.s32.totalorder %s1681_s15, %s2939_s18  ;;  %p2947_p6 = scmp.lt.s32.totalorder %s2939_s18, %s2939_s18 }
 0x32c   : > { %p2941_p13 = pnand %p2940_p12, %p3708_p3  ;;  %p2948_p9 = por %p2947_p6, %p2946_p4 }
 0x32e   : > { %p2942_p2 = pneg %p2941_p13 }
 0x330   : > { %p2949_p7 = pnand %p2948_p9, %p2942_p2 }
 0x332   : > { %2952 = shalt.err (!%p2949_p7)
}
 0x333   : > { %s2953_s24 = scalar_lea.hbm %s3757_s5, 128 }
 0x334   : > { %p2954_p11 = scmp.ne.s32.totalorder %s3757_s5, %s2953_s24  ;;  %p2959_p8 = scmp.lt.u32.totalorder %s2953_s24, %s3757_s5 }
 0x336   : > { %p2955_p1 = pnand %p2954_p11, %p3708_p3 }
 0x338   : > { %p2956_p10 = pneg %p2955_p1 }
 0x33a   : > { %p2961_p5 = pnand %p2959_p8, %p2956_p10 }
 0x33c   : > { %2964 = shalt.err (!%p2961_p5)
}
 0x33d   : > { %2707 = dma.vmem_to_hbm [thread:$0]  (%p3708_p3), %s1681_s15, 128, %s3757_s5, [#allocation5]  }
 0x33e   : > { %3002 = dma.done.wait (%p3708_p3), [#allocation5], 128  }
 0x33f   : > { %3004 = vsyncadd (%p3708_p3), [#allocation5], 4294967168 }
 0x340 PF: > { %s21_s23 = sadd.s32 1, %s3027_s23   ;;  %s3771_s18 = smov %s3011_s19 }
 0x341   : > { %p18_p0 = scmp.ge.s32.totalorder %s21_s23, 6   ;;  %s3772_s19 = smov %s3015_s20 }
 0x342   : > { %s3773_s20 = smov %s3237_s11  ;;  %s3774_s21 = smov %s3023_s22 }
 0x343   : > { %s3775_s22 = smov %s3777_s14  ;;  %20 = sbr.rel (!%p18_p0) target bundleno = 7 (0x7), region = 103 }
 0x34a   :  { %1693 = vsyncpa [#allocation4], 1 }
 0x34b   :  { %1695 = vsyncpa [#allocation4 + $0x1], 1 }
 0x34c   :  { %1696 = vsyncpa [#allocation7], 1 }
 0x34d   :  { %1697 = vsyncpa [#allocation10], 1 }
 0x34e   :  { %1698 = vsyncpa [#allocation5], 1 }
 0x34f   :  { %1700 = vsyncpa [#allocation5 + $0x1], 1 }

</bundles_post_ra>
